<compile_context>
chip_gen: v6e
topology: v6e:2x2x1
jax: 0.10.0
libtpu: 0.0.40
codegen_flags: <defaults>
</compile_context>

<pallas_src>
import functools
import numpy as np
import jax
import jax.numpy as jnp
from jax.experimental import pallas as pl
from jax.experimental.pallas import tpu as pltpu

N, H, W = 2, 16, 16
CIN, COUT = 4, 8
CPAD = 8                  # input channels zero-padded to one sublane group
NHW = N * H * W           # 512 -> lane dim (multiple of 128, unmasked stores)
EPS = 1e-5


def residual_block_kernel(x_ref, w1_ref, w2_ref, ws_ref,
                          b1_ref, g1_ref, be1_ref,
                          b2_ref, g2_ref, be2_ref,
                          gs_ref, bs_ref, mask_ref, out_ref):
    inv_n = 1.0 / float(NHW)
    x = x_ref[...]                                    # (CPAD, NHW), rows CIN..7 are zero

    def bn(z, gamma, beta):
        # Training-mode BN (biased variance), single pass: per-channel stats are
        # lane reductions in the (C, N*H*W) layout; multiply by 1/count constant.
        s1 = jnp.sum(z, axis=1, keepdims=True)
        s2 = jnp.sum(z * z, axis=1, keepdims=True)
        mean = s1 * inv_n
        var = jnp.maximum(s2 * inv_n - mean * mean, 0.0)
        return (z - mean) * (jax.lax.rsqrt(var + EPS) * gamma) + beta

    def conv3x3(z, w_taps_ref):
        # 9 taps: lane roll (output lane p reads input lane p + dy*W + dx),
        # zero the halo via a precomputed mask, channel-mix on the MXU.
        acc = jnp.zeros((COUT, NHW), jnp.float32)
        for t in range(9):
            dy, dx = t // 3 - 1, t % 3 - 1
            s = dy * W + dx
            if s == 0:
                tap = z                               # center tap: no shift, mask is all-ones
            else:
                tap = pltpu.roll(z, shift=(-s) % NHW, axis=1) * mask_ref[t]
            acc = acc + jnp.dot(w_taps_ref[t], tap,
                                preferred_element_type=jnp.float32)
        return acc

    # conv1 (3x3, pad=1) + bias + bn1 + relu
    h1 = jnp.maximum(
        bn(conv3x3(x, w1_ref) + b1_ref[...], g1_ref[...], be1_ref[...]), 0.0)
    # conv2 (3x3, pad=1) + bias + bn2  (h1 stays in vregs; no padded scratch)
    h2 = bn(conv3x3(h1, w2_ref) + b2_ref[...], g2_ref[...], be2_ref[...])
    # shortcut: 1x1 conv (no bias) + bn, reusing the already-loaded x
    res = bn(jnp.dot(ws_ref[...], x, preferred_element_type=jnp.float32),
             gs_ref[...], bs_ref[...])
    # add + final relu, written as one lane-dense (COUT, NHW) slab (unmasked vst)
    out_ref[...] = jnp.maximum(h2 + res, 0.0)


def _tap_masks():
    # Static 0/1 masks (built in numpy -> compile-time constants): zero positions
    # whose source pixel (h+dy, w+dx) falls outside the image ("same" padding).
    p = np.arange(NHW)
    h = (p % (H * W)) // W
    w = p % W
    m = np.zeros((9, CPAD, NHW), np.float32)
    for t in range(9):
        dy, dx = t // 3 - 1, t % 3 - 1
        valid = (h + dy >= 0) & (h + dy < H) & (w + dx >= 0) & (w + dx < W)
        m[t] = valid.astype(np.float32)[None, :]
    return jnp.asarray(m)


def _taps(w):
    # PyTorch OIHW (COUT, cin, 3, 3) -> per-tap (9, COUT, CPAD), zero-padded cin.
    cin = w.shape[1]
    t = jnp.transpose(w, (2, 3, 0, 1)).reshape(9, COUT, cin)
    if cin < CPAD:
        t = jnp.pad(t, ((0, 0), (0, 0), (0, CPAD - cin)))
    return t


@jax.jit
def residual_block(x_nchw, p):
    # Layout plumbing (fused by XLA): NCHW -> (C, N*H*W), channels padded to 8.
    xf = jnp.transpose(x_nchw, (1, 0, 2, 3)).reshape(CIN, NHW)
    xf = jnp.pad(xf, ((0, CPAD - CIN), (0, 0)))
    w1 = _taps(p["w1"])
    w2 = _taps(p["w2"])
    ws = jnp.pad(p["ws"].reshape(COUT, CIN), ((0, 0), (0, CPAD - CIN)))
    col = lambda v: v.reshape(COUT, 1)
    args = (xf, w1, w2, ws,
            col(p["b1"]), col(p["g1"]), col(p["be1"]),
            col(p["b2"]), col(p["g2"]), col(p["be2"]),
            col(p["gs"]), col(p["bs"]), _tap_masks())

    # TODO(synk): on v7x, shard the NHW lane dim across the two TensorCores
    # (needs a cross-core reduction for the BatchNorm statistics).
    out_flat = pl.pallas_call(
        residual_block_kernel,
        out_shape=jax.ShapeDtypeStruct((COUT, NHW), jnp.float32),
        in_specs=[pl.BlockSpec(memory_space=pltpu.MemorySpace.VMEM)] * len(args),
        out_specs=pl.BlockSpec(memory_space=pltpu.MemorySpace.VMEM),
    )(*args)

    # (COUT, N*H*W) -> NCHW
    return jnp.transpose(out_flat.reshape(COUT, N, H, W), (1, 0, 2, 3))


@jax.jit
def reference(x, p):
    conv = functools.partial(jax.lax.conv_general_dilated,
                             window_strides=(1, 1), padding="SAME",
                             dimension_numbers=("NCHW", "OIHW", "NCHW"))

    def bn(z, g, b):
        mu = jnp.mean(z, axis=(0, 2, 3), keepdims=True)
        var = jnp.mean((z - mu) ** 2, axis=(0, 2, 3), keepdims=True)
        return ((z - mu) * jax.lax.rsqrt(var + EPS) * g.reshape(1, -1, 1, 1)
                + b.reshape(1, -1, 1, 1))

    h = jax.nn.relu(bn(conv(x, p["w1"]) + p["b1"].reshape(1, -1, 1, 1),
                       p["g1"], p["be1"]))
    h2 = bn(conv(h, p["w2"]) + p["b2"].reshape(1, -1, 1, 1), p["g2"], p["be2"])
    res = bn(conv(x, p["ws"]), p["gs"], p["bs"])
    return jax.nn.relu(h2 + res)


if __name__ == "__main__":
    key = jax.random.PRNGKey(0)
    ks = jax.random.split(key, 12)
    x = jax.random.normal(ks[0], (N, CIN, H, W), jnp.float32)      # NCHW, like PyTorch
    params = {
        "w1": 0.1 * jax.random.normal(ks[1], (COUT, CIN, 3, 3), jnp.float32),
        "b1": 0.1 * jax.random.normal(ks[2], (COUT,), jnp.float32),
        "g1": 1.0 + 0.1 * jax.random.normal(ks[3], (COUT,), jnp.float32),
        "be1": 0.1 * jax.random.normal(ks[4], (COUT,), jnp.float32),
        "w2": 0.1 * jax.random.normal(ks[5], (COUT, COUT, 3, 3), jnp.float32),
        "b2": 0.1 * jax.random.normal(ks[6], (COUT,), jnp.float32),
        "g2": 1.0 + 0.1 * jax.random.normal(ks[7], (COUT,), jnp.float32),
        "be2": 0.1 * jax.random.normal(ks[8], (COUT,), jnp.float32),
        "ws": 0.1 * jax.random.normal(ks[9], (COUT, CIN, 1, 1), jnp.float32),
        "gs": 1.0 + 0.1 * jax.random.normal(ks[10], (COUT,), jnp.float32),
        "bs": 0.1 * jax.random.normal(ks[11], (COUT,), jnp.float32),
    }

    out = jax.block_until_ready(residual_block(x, params))
    ref = jax.block_until_ready(reference(x, params))

    assert out.shape == (N, COUT, H, W)
    max_err = float(jnp.max(jnp.abs(out - ref)))
    assert jnp.allclose(out, ref, atol=1e-4, rtol=1e-4), max_err
    print("KERNEL_OK")
</pallas_src>

<mosaic_0001>
module attributes {stable_mosaic.version = 11 : i64} {
  func.func @residual_block_kernel(%arg0: memref<8x512xf32, #tpu.memory_space<vmem>>, %arg1: memref<9x8x8xf32, #tpu.memory_space<vmem>>, %arg2: memref<9x8x8xf32, #tpu.memory_space<vmem>>, %arg3: memref<8x8xf32, #tpu.memory_space<vmem>>, %arg4: memref<8x1xf32, #tpu.memory_space<vmem>>, %arg5: memref<8x1xf32, #tpu.memory_space<vmem>>, %arg6: memref<8x1xf32, #tpu.memory_space<vmem>>, %arg7: memref<8x1xf32, #tpu.memory_space<vmem>>, %arg8: memref<8x1xf32, #tpu.memory_space<vmem>>, %arg9: memref<8x1xf32, #tpu.memory_space<vmem>>, %arg10: memref<8x1xf32, #tpu.memory_space<vmem>>, %arg11: memref<8x1xf32, #tpu.memory_space<vmem>>, %arg12: memref<9x8x512xf32, #tpu.memory_space<vmem>>, %arg13: memref<8x512xf32, #tpu.memory_space<vmem>>) attributes {dimension_semantics = [], scalar_prefetch = 0 : i64, scratch_operands = 0 : i64, tpu.core_type = #tpu.core_type<tc>} {
    %c0 = arith.constant 0 : index
    %c0_0 = arith.constant 0 : index
    %0 = vector.load %arg0[%c0, %c0_0] : memref<8x512xf32, #tpu.memory_space<vmem>>, vector<8x512xf32>
    %cst = arith.constant 0.000000e+00 : f32
    %1 = vector.broadcast %cst : f32 to vector<8x512xf32>
    %c17_i32 = arith.constant 17 : i32
    %2 = tpu.dynamic_rotate %0 by %c17_i32 dim 1 : vector<8x512xf32>, i32 -> vector<8x512xf32>
    %c0_1 = arith.constant 0 : index
    %c0_2 = arith.constant 0 : index
    %c0_3 = arith.constant 0 : index
    %3 = vector.load %arg12[%c0_1, %c0_2, %c0_3] : memref<9x8x512xf32, #tpu.memory_space<vmem>>, vector<1x8x512xf32>
    %4 = vector.shape_cast %3 : vector<1x8x512xf32> to vector<8x512xf32>
    %5 = arith.mulf %2, %4 : vector<8x512xf32>
    %c0_4 = arith.constant 0 : index
    %c0_5 = arith.constant 0 : index
    %c0_6 = arith.constant 0 : index
    %6 = vector.load %arg1[%c0_4, %c0_5, %c0_6] : memref<9x8x8xf32, #tpu.memory_space<vmem>>, vector<1x8x8xf32>
    %7 = vector.shape_cast %6 : vector<1x8x8xf32> to vector<8x8xf32>
    %cst_7 = arith.constant dense<0.000000e+00> : vector<8x512xf32>
    %8 = tpu.matmul %7, %5, %cst_7 {dimension_numbers = #tpu.dot_dimension_numbers<[1], [0], [0], [1], [0, 0, 1, 1], [], []>} : vector<8x8xf32>, vector<8x512xf32>, vector<8x512xf32> -> vector<8x512xf32>
    %9 = arith.addf %1, %8 : vector<8x512xf32>
    %c16_i32 = arith.constant 16 : i32
    %10 = tpu.dynamic_rotate %0 by %c16_i32 dim 1 : vector<8x512xf32>, i32 -> vector<8x512xf32>
    %c1 = arith.constant 1 : index
    %c0_8 = arith.constant 0 : index
    %c0_9 = arith.constant 0 : index
    %11 = vector.load %arg12[%c1, %c0_8, %c0_9] : memref<9x8x512xf32, #tpu.memory_space<vmem>>, vector<1x8x512xf32>
    %12 = vector.shape_cast %11 : vector<1x8x512xf32> to vector<8x512xf32>
    %13 = arith.mulf %10, %12 : vector<8x512xf32>
    %c1_10 = arith.constant 1 : index
    %c0_11 = arith.constant 0 : index
    %c0_12 = arith.constant 0 : index
    %14 = vector.load %arg1[%c1_10, %c0_11, %c0_12] : memref<9x8x8xf32, #tpu.memory_space<vmem>>, vector<1x8x8xf32>
    %15 = vector.shape_cast %14 : vector<1x8x8xf32> to vector<8x8xf32>
    %cst_13 = arith.constant dense<0.000000e+00> : vector<8x512xf32>
    %16 = tpu.matmul %15, %13, %cst_13 {dimension_numbers = #tpu.dot_dimension_numbers<[1], [0], [0], [1], [0, 0, 1, 1], [], []>} : vector<8x8xf32>, vector<8x512xf32>, vector<8x512xf32> -> vector<8x512xf32>
    %17 = arith.addf %9, %16 : vector<8x512xf32>
    %c15_i32 = arith.constant 15 : i32
    %18 = tpu.dynamic_rotate %0 by %c15_i32 dim 1 : vector<8x512xf32>, i32 -> vector<8x512xf32>
    %c2 = arith.constant 2 : index
    %c0_14 = arith.constant 0 : index
    %c0_15 = arith.constant 0 : index
    %19 = vector.load %arg12[%c2, %c0_14, %c0_15] : memref<9x8x512xf32, #tpu.memory_space<vmem>>, vector<1x8x512xf32>
    %20 = vector.shape_cast %19 : vector<1x8x512xf32> to vector<8x512xf32>
    %21 = arith.mulf %18, %20 : vector<8x512xf32>
    %c2_16 = arith.constant 2 : index
    %c0_17 = arith.constant 0 : index
    %c0_18 = arith.constant 0 : index
    %22 = vector.load %arg1[%c2_16, %c0_17, %c0_18] : memref<9x8x8xf32, #tpu.memory_space<vmem>>, vector<1x8x8xf32>
    %23 = vector.shape_cast %22 : vector<1x8x8xf32> to vector<8x8xf32>
    %cst_19 = arith.constant dense<0.000000e+00> : vector<8x512xf32>
    %24 = tpu.matmul %23, %21, %cst_19 {dimension_numbers = #tpu.dot_dimension_numbers<[1], [0], [0], [1], [0, 0, 1, 1], [], []>} : vector<8x8xf32>, vector<8x512xf32>, vector<8x512xf32> -> vector<8x512xf32>
    %25 = arith.addf %17, %24 : vector<8x512xf32>
    %c1_i32 = arith.constant 1 : i32
    %26 = tpu.dynamic_rotate %0 by %c1_i32 dim 1 : vector<8x512xf32>, i32 -> vector<8x512xf32>
    %c3 = arith.constant 3 : index
    %c0_20 = arith.constant 0 : index
    %c0_21 = arith.constant 0 : index
    %27 = vector.load %arg12[%c3, %c0_20, %c0_21] : memref<9x8x512xf32, #tpu.memory_space<vmem>>, vector<1x8x512xf32>
    %28 = vector.shape_cast %27 : vector<1x8x512xf32> to vector<8x512xf32>
    %29 = arith.mulf %26, %28 : vector<8x512xf32>
    %c3_22 = arith.constant 3 : index
    %c0_23 = arith.constant 0 : index
    %c0_24 = arith.constant 0 : index
    %30 = vector.load %arg1[%c3_22, %c0_23, %c0_24] : memref<9x8x8xf32, #tpu.memory_space<vmem>>, vector<1x8x8xf32>
    %31 = vector.shape_cast %30 : vector<1x8x8xf32> to vector<8x8xf32>
    %cst_25 = arith.constant dense<0.000000e+00> : vector<8x512xf32>
    %32 = tpu.matmul %31, %29, %cst_25 {dimension_numbers = #tpu.dot_dimension_numbers<[1], [0], [0], [1], [0, 0, 1, 1], [], []>} : vector<8x8xf32>, vector<8x512xf32>, vector<8x512xf32> -> vector<8x512xf32>
    %33 = arith.addf %25, %32 : vector<8x512xf32>
    %c4 = arith.constant 4 : index
    %c0_26 = arith.constant 0 : index
    %c0_27 = arith.constant 0 : index
    %34 = vector.load %arg1[%c4, %c0_26, %c0_27] : memref<9x8x8xf32, #tpu.memory_space<vmem>>, vector<1x8x8xf32>
    %35 = vector.shape_cast %34 : vector<1x8x8xf32> to vector<8x8xf32>
    %cst_28 = arith.constant dense<0.000000e+00> : vector<8x512xf32>
    %36 = tpu.matmul %35, %0, %cst_28 {dimension_numbers = #tpu.dot_dimension_numbers<[1], [0], [0], [1], [0, 0, 1, 1], [], []>} : vector<8x8xf32>, vector<8x512xf32>, vector<8x512xf32> -> vector<8x512xf32>
    %37 = arith.addf %33, %36 : vector<8x512xf32>
    %c511_i32 = arith.constant 511 : i32
    %38 = tpu.dynamic_rotate %0 by %c511_i32 dim 1 : vector<8x512xf32>, i32 -> vector<8x512xf32>
    %c5 = arith.constant 5 : index
    %c0_29 = arith.constant 0 : index
    %c0_30 = arith.constant 0 : index
    %39 = vector.load %arg12[%c5, %c0_29, %c0_30] : memref<9x8x512xf32, #tpu.memory_space<vmem>>, vector<1x8x512xf32>
    %40 = vector.shape_cast %39 : vector<1x8x512xf32> to vector<8x512xf32>
    %41 = arith.mulf %38, %40 : vector<8x512xf32>
    %c5_31 = arith.constant 5 : index
    %c0_32 = arith.constant 0 : index
    %c0_33 = arith.constant 0 : index
    %42 = vector.load %arg1[%c5_31, %c0_32, %c0_33] : memref<9x8x8xf32, #tpu.memory_space<vmem>>, vector<1x8x8xf32>
    %43 = vector.shape_cast %42 : vector<1x8x8xf32> to vector<8x8xf32>
    %cst_34 = arith.constant dense<0.000000e+00> : vector<8x512xf32>
    %44 = tpu.matmul %43, %41, %cst_34 {dimension_numbers = #tpu.dot_dimension_numbers<[1], [0], [0], [1], [0, 0, 1, 1], [], []>} : vector<8x8xf32>, vector<8x512xf32>, vector<8x512xf32> -> vector<8x512xf32>
    %45 = arith.addf %37, %44 : vector<8x512xf32>
    %c497_i32 = arith.constant 497 : i32
    %46 = tpu.dynamic_rotate %0 by %c497_i32 dim 1 : vector<8x512xf32>, i32 -> vector<8x512xf32>
    %c6 = arith.constant 6 : index
    %c0_35 = arith.constant 0 : index
    %c0_36 = arith.constant 0 : index
    %47 = vector.load %arg12[%c6, %c0_35, %c0_36] : memref<9x8x512xf32, #tpu.memory_space<vmem>>, vector<1x8x512xf32>
    %48 = vector.shape_cast %47 : vector<1x8x512xf32> to vector<8x512xf32>
    %49 = arith.mulf %46, %48 : vector<8x512xf32>
    %c6_37 = arith.constant 6 : index
    %c0_38 = arith.constant 0 : index
    %c0_39 = arith.constant 0 : index
    %50 = vector.load %arg1[%c6_37, %c0_38, %c0_39] : memref<9x8x8xf32, #tpu.memory_space<vmem>>, vector<1x8x8xf32>
    %51 = vector.shape_cast %50 : vector<1x8x8xf32> to vector<8x8xf32>
    %cst_40 = arith.constant dense<0.000000e+00> : vector<8x512xf32>
    %52 = tpu.matmul %51, %49, %cst_40 {dimension_numbers = #tpu.dot_dimension_numbers<[1], [0], [0], [1], [0, 0, 1, 1], [], []>} : vector<8x8xf32>, vector<8x512xf32>, vector<8x512xf32> -> vector<8x512xf32>
    %53 = arith.addf %45, %52 : vector<8x512xf32>
    %c496_i32 = arith.constant 496 : i32
    %54 = tpu.dynamic_rotate %0 by %c496_i32 dim 1 : vector<8x512xf32>, i32 -> vector<8x512xf32>
    %c7 = arith.constant 7 : index
    %c0_41 = arith.constant 0 : index
    %c0_42 = arith.constant 0 : index
    %55 = vector.load %arg12[%c7, %c0_41, %c0_42] : memref<9x8x512xf32, #tpu.memory_space<vmem>>, vector<1x8x512xf32>
    %56 = vector.shape_cast %55 : vector<1x8x512xf32> to vector<8x512xf32>
    %57 = arith.mulf %54, %56 : vector<8x512xf32>
    %c7_43 = arith.constant 7 : index
    %c0_44 = arith.constant 0 : index
    %c0_45 = arith.constant 0 : index
    %58 = vector.load %arg1[%c7_43, %c0_44, %c0_45] : memref<9x8x8xf32, #tpu.memory_space<vmem>>, vector<1x8x8xf32>
    %59 = vector.shape_cast %58 : vector<1x8x8xf32> to vector<8x8xf32>
    %cst_46 = arith.constant dense<0.000000e+00> : vector<8x512xf32>
    %60 = tpu.matmul %59, %57, %cst_46 {dimension_numbers = #tpu.dot_dimension_numbers<[1], [0], [0], [1], [0, 0, 1, 1], [], []>} : vector<8x8xf32>, vector<8x512xf32>, vector<8x512xf32> -> vector<8x512xf32>
    %61 = arith.addf %53, %60 : vector<8x512xf32>
    %c495_i32 = arith.constant 495 : i32
    %62 = tpu.dynamic_rotate %0 by %c495_i32 dim 1 : vector<8x512xf32>, i32 -> vector<8x512xf32>
    %c8 = arith.constant 8 : index
    %c0_47 = arith.constant 0 : index
    %c0_48 = arith.constant 0 : index
    %63 = vector.load %arg12[%c8, %c0_47, %c0_48] : memref<9x8x512xf32, #tpu.memory_space<vmem>>, vector<1x8x512xf32>
    %64 = vector.shape_cast %63 : vector<1x8x512xf32> to vector<8x512xf32>
    %65 = arith.mulf %62, %64 : vector<8x512xf32>
    %c8_49 = arith.constant 8 : index
    %c0_50 = arith.constant 0 : index
    %c0_51 = arith.constant 0 : index
    %66 = vector.load %arg1[%c8_49, %c0_50, %c0_51] : memref<9x8x8xf32, #tpu.memory_space<vmem>>, vector<1x8x8xf32>
    %67 = vector.shape_cast %66 : vector<1x8x8xf32> to vector<8x8xf32>
    %cst_52 = arith.constant dense<0.000000e+00> : vector<8x512xf32>
    %68 = tpu.matmul %67, %65, %cst_52 {dimension_numbers = #tpu.dot_dimension_numbers<[1], [0], [0], [1], [0, 0, 1, 1], [], []>} : vector<8x8xf32>, vector<8x512xf32>, vector<8x512xf32> -> vector<8x512xf32>
    %69 = arith.addf %61, %68 : vector<8x512xf32>
    %c0_53 = arith.constant 0 : index
    %c0_54 = arith.constant 0 : index
    %70 = vector.load %arg4[%c0_53, %c0_54] : memref<8x1xf32, #tpu.memory_space<vmem>>, vector<8x1xf32>
    %71 = vector.broadcast %70 : vector<8x1xf32> to vector<8x512xf32>
    %72 = arith.addf %69, %71 : vector<8x512xf32>
    %c0_55 = arith.constant 0 : index
    %c0_56 = arith.constant 0 : index
    %73 = vector.load %arg5[%c0_55, %c0_56] : memref<8x1xf32, #tpu.memory_space<vmem>>, vector<8x1xf32>
    %c0_57 = arith.constant 0 : index
    %c0_58 = arith.constant 0 : index
    %74 = vector.load %arg6[%c0_57, %c0_58] : memref<8x1xf32, #tpu.memory_space<vmem>>, vector<8x1xf32>
    %cst_59 = arith.constant dense<0.000000e+00> : vector<8xf32>
    %75 = vector.multi_reduction <add>, %72, %cst_59 [1] : vector<8x512xf32> to vector<8xf32>
    %76 = vector.shape_cast %75 : vector<8xf32> to vector<8x1xf32>
    %77 = arith.mulf %72, %72 : vector<8x512xf32>
    %cst_60 = arith.constant dense<0.000000e+00> : vector<8xf32>
    %78 = vector.multi_reduction <add>, %77, %cst_60 [1] : vector<8x512xf32> to vector<8xf32>
    %79 = vector.shape_cast %78 : vector<8xf32> to vector<8x1xf32>
    %cst_61 = arith.constant 0.001953125 : f32
    %80 = vector.broadcast %cst_61 : f32 to vector<8x1xf32>
    %81 = arith.mulf %76, %80 : vector<8x1xf32>
    %cst_62 = arith.constant 0.001953125 : f32
    %82 = vector.broadcast %cst_62 : f32 to vector<8x1xf32>
    %83 = arith.mulf %79, %82 : vector<8x1xf32>
    %84 = arith.mulf %81, %81 : vector<8x1xf32>
    %85 = arith.subf %83, %84 : vector<8x1xf32>
    %cst_63 = arith.constant 0.000000e+00 : f32
    %86 = vector.broadcast %cst_63 : f32 to vector<8x1xf32>
    %87 = arith.maximumf %85, %86 : vector<8x1xf32>
    %88 = vector.broadcast %81 : vector<8x1xf32> to vector<8x512xf32>
    %89 = arith.subf %72, %88 : vector<8x512xf32>
    %cst_64 = arith.constant 9.99999974E-6 : f32
    %90 = vector.broadcast %cst_64 : f32 to vector<8x1xf32>
    %91 = arith.addf %87, %90 : vector<8x1xf32>
    %92 = math.rsqrt %91 : vector<8x1xf32>
    %93 = arith.mulf %92, %73 : vector<8x1xf32>
    %94 = vector.broadcast %93 : vector<8x1xf32> to vector<8x512xf32>
    %95 = arith.mulf %89, %94 : vector<8x512xf32>
    %96 = vector.broadcast %74 : vector<8x1xf32> to vector<8x512xf32>
    %97 = arith.addf %95, %96 : vector<8x512xf32>
    %cst_65 = arith.constant 0.000000e+00 : f32
    %98 = vector.broadcast %cst_65 : f32 to vector<8x512xf32>
    %99 = arith.maximumf %97, %98 : vector<8x512xf32>
    %cst_66 = arith.constant 0.000000e+00 : f32
    %100 = vector.broadcast %cst_66 : f32 to vector<8x512xf32>
    %c17_i32_67 = arith.constant 17 : i32
    %101 = tpu.dynamic_rotate %99 by %c17_i32_67 dim 1 : vector<8x512xf32>, i32 -> vector<8x512xf32>
    %c0_68 = arith.constant 0 : index
    %c0_69 = arith.constant 0 : index
    %c0_70 = arith.constant 0 : index
    %102 = vector.load %arg12[%c0_68, %c0_69, %c0_70] : memref<9x8x512xf32, #tpu.memory_space<vmem>>, vector<1x8x512xf32>
    %103 = vector.shape_cast %102 : vector<1x8x512xf32> to vector<8x512xf32>
    %104 = arith.mulf %101, %103 : vector<8x512xf32>
    %c0_71 = arith.constant 0 : index
    %c0_72 = arith.constant 0 : index
    %c0_73 = arith.constant 0 : index
    %105 = vector.load %arg2[%c0_71, %c0_72, %c0_73] : memref<9x8x8xf32, #tpu.memory_space<vmem>>, vector<1x8x8xf32>
    %106 = vector.shape_cast %105 : vector<1x8x8xf32> to vector<8x8xf32>
    %cst_74 = arith.constant dense<0.000000e+00> : vector<8x512xf32>
    %107 = tpu.matmul %106, %104, %cst_74 {dimension_numbers = #tpu.dot_dimension_numbers<[1], [0], [0], [1], [0, 0, 1, 1], [], []>} : vector<8x8xf32>, vector<8x512xf32>, vector<8x512xf32> -> vector<8x512xf32>
    %108 = arith.addf %100, %107 : vector<8x512xf32>
    %c16_i32_75 = arith.constant 16 : i32
    %109 = tpu.dynamic_rotate %99 by %c16_i32_75 dim 1 : vector<8x512xf32>, i32 -> vector<8x512xf32>
    %c1_76 = arith.constant 1 : index
    %c0_77 = arith.constant 0 : index
    %c0_78 = arith.constant 0 : index
    %110 = vector.load %arg12[%c1_76, %c0_77, %c0_78] : memref<9x8x512xf32, #tpu.memory_space<vmem>>, vector<1x8x512xf32>
    %111 = vector.shape_cast %110 : vector<1x8x512xf32> to vector<8x512xf32>
    %112 = arith.mulf %109, %111 : vector<8x512xf32>
    %c1_79 = arith.constant 1 : index
    %c0_80 = arith.constant 0 : index
    %c0_81 = arith.constant 0 : index
    %113 = vector.load %arg2[%c1_79, %c0_80, %c0_81] : memref<9x8x8xf32, #tpu.memory_space<vmem>>, vector<1x8x8xf32>
    %114 = vector.shape_cast %113 : vector<1x8x8xf32> to vector<8x8xf32>
    %cst_82 = arith.constant dense<0.000000e+00> : vector<8x512xf32>
    %115 = tpu.matmul %114, %112, %cst_82 {dimension_numbers = #tpu.dot_dimension_numbers<[1], [0], [0], [1], [0, 0, 1, 1], [], []>} : vector<8x8xf32>, vector<8x512xf32>, vector<8x512xf32> -> vector<8x512xf32>
    %116 = arith.addf %108, %115 : vector<8x512xf32>
    %c15_i32_83 = arith.constant 15 : i32
    %117 = tpu.dynamic_rotate %99 by %c15_i32_83 dim 1 : vector<8x512xf32>, i32 -> vector<8x512xf32>
    %c2_84 = arith.constant 2 : index
    %c0_85 = arith.constant 0 : index
    %c0_86 = arith.constant 0 : index
    %118 = vector.load %arg12[%c2_84, %c0_85, %c0_86] : memref<9x8x512xf32, #tpu.memory_space<vmem>>, vector<1x8x512xf32>
    %119 = vector.shape_cast %118 : vector<1x8x512xf32> to vector<8x512xf32>
    %120 = arith.mulf %117, %119 : vector<8x512xf32>
    %c2_87 = arith.constant 2 : index
    %c0_88 = arith.constant 0 : index
    %c0_89 = arith.constant 0 : index
    %121 = vector.load %arg2[%c2_87, %c0_88, %c0_89] : memref<9x8x8xf32, #tpu.memory_space<vmem>>, vector<1x8x8xf32>
    %122 = vector.shape_cast %121 : vector<1x8x8xf32> to vector<8x8xf32>
    %cst_90 = arith.constant dense<0.000000e+00> : vector<8x512xf32>
    %123 = tpu.matmul %122, %120, %cst_90 {dimension_numbers = #tpu.dot_dimension_numbers<[1], [0], [0], [1], [0, 0, 1, 1], [], []>} : vector<8x8xf32>, vector<8x512xf32>, vector<8x512xf32> -> vector<8x512xf32>
    %124 = arith.addf %116, %123 : vector<8x512xf32>
    %c1_i32_91 = arith.constant 1 : i32
    %125 = tpu.dynamic_rotate %99 by %c1_i32_91 dim 1 : vector<8x512xf32>, i32 -> vector<8x512xf32>
    %c3_92 = arith.constant 3 : index
    %c0_93 = arith.constant 0 : index
    %c0_94 = arith.constant 0 : index
    %126 = vector.load %arg12[%c3_92, %c0_93, %c0_94] : memref<9x8x512xf32, #tpu.memory_space<vmem>>, vector<1x8x512xf32>
    %127 = vector.shape_cast %126 : vector<1x8x512xf32> to vector<8x512xf32>
    %128 = arith.mulf %125, %127 : vector<8x512xf32>
    %c3_95 = arith.constant 3 : index
    %c0_96 = arith.constant 0 : index
    %c0_97 = arith.constant 0 : index
    %129 = vector.load %arg2[%c3_95, %c0_96, %c0_97] : memref<9x8x8xf32, #tpu.memory_space<vmem>>, vector<1x8x8xf32>
    %130 = vector.shape_cast %129 : vector<1x8x8xf32> to vector<8x8xf32>
    %cst_98 = arith.constant dense<0.000000e+00> : vector<8x512xf32>
    %131 = tpu.matmul %130, %128, %cst_98 {dimension_numbers = #tpu.dot_dimension_numbers<[1], [0], [0], [1], [0, 0, 1, 1], [], []>} : vector<8x8xf32>, vector<8x512xf32>, vector<8x512xf32> -> vector<8x512xf32>
    %132 = arith.addf %124, %131 : vector<8x512xf32>
    %c4_99 = arith.constant 4 : index
    %c0_100 = arith.constant 0 : index
    %c0_101 = arith.constant 0 : index
    %133 = vector.load %arg2[%c4_99, %c0_100, %c0_101] : memref<9x8x8xf32, #tpu.memory_space<vmem>>, vector<1x8x8xf32>
    %134 = vector.shape_cast %133 : vector<1x8x8xf32> to vector<8x8xf32>
    %cst_102 = arith.constant dense<0.000000e+00> : vector<8x512xf32>
    %135 = tpu.matmul %134, %99, %cst_102 {dimension_numbers = #tpu.dot_dimension_numbers<[1], [0], [0], [1], [0, 0, 1, 1], [], []>} : vector<8x8xf32>, vector<8x512xf32>, vector<8x512xf32> -> vector<8x512xf32>
    %136 = arith.addf %132, %135 : vector<8x512xf32>
    %c511_i32_103 = arith.constant 511 : i32
    %137 = tpu.dynamic_rotate %99 by %c511_i32_103 dim 1 : vector<8x512xf32>, i32 -> vector<8x512xf32>
    %c5_104 = arith.constant 5 : index
    %c0_105 = arith.constant 0 : index
    %c0_106 = arith.constant 0 : index
    %138 = vector.load %arg12[%c5_104, %c0_105, %c0_106] : memref<9x8x512xf32, #tpu.memory_space<vmem>>, vector<1x8x512xf32>
    %139 = vector.shape_cast %138 : vector<1x8x512xf32> to vector<8x512xf32>
    %140 = arith.mulf %137, %139 : vector<8x512xf32>
    %c5_107 = arith.constant 5 : index
    %c0_108 = arith.constant 0 : index
    %c0_109 = arith.constant 0 : index
    %141 = vector.load %arg2[%c5_107, %c0_108, %c0_109] : memref<9x8x8xf32, #tpu.memory_space<vmem>>, vector<1x8x8xf32>
    %142 = vector.shape_cast %141 : vector<1x8x8xf32> to vector<8x8xf32>
    %cst_110 = arith.constant dense<0.000000e+00> : vector<8x512xf32>
    %143 = tpu.matmul %142, %140, %cst_110 {dimension_numbers = #tpu.dot_dimension_numbers<[1], [0], [0], [1], [0, 0, 1, 1], [], []>} : vector<8x8xf32>, vector<8x512xf32>, vector<8x512xf32> -> vector<8x512xf32>
    %144 = arith.addf %136, %143 : vector<8x512xf32>
    %c497_i32_111 = arith.constant 497 : i32
    %145 = tpu.dynamic_rotate %99 by %c497_i32_111 dim 1 : vector<8x512xf32>, i32 -> vector<8x512xf32>
    %c6_112 = arith.constant 6 : index
    %c0_113 = arith.constant 0 : index
    %c0_114 = arith.constant 0 : index
    %146 = vector.load %arg12[%c6_112, %c0_113, %c0_114] : memref<9x8x512xf32, #tpu.memory_space<vmem>>, vector<1x8x512xf32>
    %147 = vector.shape_cast %146 : vector<1x8x512xf32> to vector<8x512xf32>
    %148 = arith.mulf %145, %147 : vector<8x512xf32>
    %c6_115 = arith.constant 6 : index
    %c0_116 = arith.constant 0 : index
    %c0_117 = arith.constant 0 : index
    %149 = vector.load %arg2[%c6_115, %c0_116, %c0_117] : memref<9x8x8xf32, #tpu.memory_space<vmem>>, vector<1x8x8xf32>
    %150 = vector.shape_cast %149 : vector<1x8x8xf32> to vector<8x8xf32>
    %cst_118 = arith.constant dense<0.000000e+00> : vector<8x512xf32>
    %151 = tpu.matmul %150, %148, %cst_118 {dimension_numbers = #tpu.dot_dimension_numbers<[1], [0], [0], [1], [0, 0, 1, 1], [], []>} : vector<8x8xf32>, vector<8x512xf32>, vector<8x512xf32> -> vector<8x512xf32>
    %152 = arith.addf %144, %151 : vector<8x512xf32>
    %c496_i32_119 = arith.constant 496 : i32
    %153 = tpu.dynamic_rotate %99 by %c496_i32_119 dim 1 : vector<8x512xf32>, i32 -> vector<8x512xf32>
    %c7_120 = arith.constant 7 : index
    %c0_121 = arith.constant 0 : index
    %c0_122 = arith.constant 0 : index
    %154 = vector.load %arg12[%c7_120, %c0_121, %c0_122] : memref<9x8x512xf32, #tpu.memory_space<vmem>>, vector<1x8x512xf32>
    %155 = vector.shape_cast %154 : vector<1x8x512xf32> to vector<8x512xf32>
    %156 = arith.mulf %153, %155 : vector<8x512xf32>
    %c7_123 = arith.constant 7 : index
    %c0_124 = arith.constant 0 : index
    %c0_125 = arith.constant 0 : index
    %157 = vector.load %arg2[%c7_123, %c0_124, %c0_125] : memref<9x8x8xf32, #tpu.memory_space<vmem>>, vector<1x8x8xf32>
    %158 = vector.shape_cast %157 : vector<1x8x8xf32> to vector<8x8xf32>
    %cst_126 = arith.constant dense<0.000000e+00> : vector<8x512xf32>
    %159 = tpu.matmul %158, %156, %cst_126 {dimension_numbers = #tpu.dot_dimension_numbers<[1], [0], [0], [1], [0, 0, 1, 1], [], []>} : vector<8x8xf32>, vector<8x512xf32>, vector<8x512xf32> -> vector<8x512xf32>
    %160 = arith.addf %152, %159 : vector<8x512xf32>
    %c495_i32_127 = arith.constant 495 : i32
    %161 = tpu.dynamic_rotate %99 by %c495_i32_127 dim 1 : vector<8x512xf32>, i32 -> vector<8x512xf32>
    %c8_128 = arith.constant 8 : index
    %c0_129 = arith.constant 0 : index
    %c0_130 = arith.constant 0 : index
    %162 = vector.load %arg12[%c8_128, %c0_129, %c0_130] : memref<9x8x512xf32, #tpu.memory_space<vmem>>, vector<1x8x512xf32>
    %163 = vector.shape_cast %162 : vector<1x8x512xf32> to vector<8x512xf32>
    %164 = arith.mulf %161, %163 : vector<8x512xf32>
    %c8_131 = arith.constant 8 : index
    %c0_132 = arith.constant 0 : index
    %c0_133 = arith.constant 0 : index
    %165 = vector.load %arg2[%c8_131, %c0_132, %c0_133] : memref<9x8x8xf32, #tpu.memory_space<vmem>>, vector<1x8x8xf32>
    %166 = vector.shape_cast %165 : vector<1x8x8xf32> to vector<8x8xf32>
    %cst_134 = arith.constant dense<0.000000e+00> : vector<8x512xf32>
    %167 = tpu.matmul %166, %164, %cst_134 {dimension_numbers = #tpu.dot_dimension_numbers<[1], [0], [0], [1], [0, 0, 1, 1], [], []>} : vector<8x8xf32>, vector<8x512xf32>, vector<8x512xf32> -> vector<8x512xf32>
    %168 = arith.addf %160, %167 : vector<8x512xf32>
    %c0_135 = arith.constant 0 : index
    %c0_136 = arith.constant 0 : index
    %169 = vector.load %arg7[%c0_135, %c0_136] : memref<8x1xf32, #tpu.memory_space<vmem>>, vector<8x1xf32>
    %170 = vector.broadcast %169 : vector<8x1xf32> to vector<8x512xf32>
    %171 = arith.addf %168, %170 : vector<8x512xf32>
    %c0_137 = arith.constant 0 : index
    %c0_138 = arith.constant 0 : index
    %172 = vector.load %arg8[%c0_137, %c0_138] : memref<8x1xf32, #tpu.memory_space<vmem>>, vector<8x1xf32>
    %c0_139 = arith.constant 0 : index
    %c0_140 = arith.constant 0 : index
    %173 = vector.load %arg9[%c0_139, %c0_140] : memref<8x1xf32, #tpu.memory_space<vmem>>, vector<8x1xf32>
    %cst_141 = arith.constant dense<0.000000e+00> : vector<8xf32>
    %174 = vector.multi_reduction <add>, %171, %cst_141 [1] : vector<8x512xf32> to vector<8xf32>
    %175 = vector.shape_cast %174 : vector<8xf32> to vector<8x1xf32>
    %176 = arith.mulf %171, %171 : vector<8x512xf32>
    %cst_142 = arith.constant dense<0.000000e+00> : vector<8xf32>
    %177 = vector.multi_reduction <add>, %176, %cst_142 [1] : vector<8x512xf32> to vector<8xf32>
    %178 = vector.shape_cast %177 : vector<8xf32> to vector<8x1xf32>
    %cst_143 = arith.constant 0.001953125 : f32
    %179 = vector.broadcast %cst_143 : f32 to vector<8x1xf32>
    %180 = arith.mulf %175, %179 : vector<8x1xf32>
    %cst_144 = arith.constant 0.001953125 : f32
    %181 = vector.broadcast %cst_144 : f32 to vector<8x1xf32>
    %182 = arith.mulf %178, %181 : vector<8x1xf32>
    %183 = arith.mulf %180, %180 : vector<8x1xf32>
    %184 = arith.subf %182, %183 : vector<8x1xf32>
    %cst_145 = arith.constant 0.000000e+00 : f32
    %185 = vector.broadcast %cst_145 : f32 to vector<8x1xf32>
    %186 = arith.maximumf %184, %185 : vector<8x1xf32>
    %187 = vector.broadcast %180 : vector<8x1xf32> to vector<8x512xf32>
    %188 = arith.subf %171, %187 : vector<8x512xf32>
    %cst_146 = arith.constant 9.99999974E-6 : f32
    %189 = vector.broadcast %cst_146 : f32 to vector<8x1xf32>
    %190 = arith.addf %186, %189 : vector<8x1xf32>
    %191 = math.rsqrt %190 : vector<8x1xf32>
    %192 = arith.mulf %191, %172 : vector<8x1xf32>
    %193 = vector.broadcast %192 : vector<8x1xf32> to vector<8x512xf32>
    %194 = arith.mulf %188, %193 : vector<8x512xf32>
    %195 = vector.broadcast %173 : vector<8x1xf32> to vector<8x512xf32>
    %196 = arith.addf %194, %195 : vector<8x512xf32>
    %c0_147 = arith.constant 0 : index
    %c0_148 = arith.constant 0 : index
    %197 = vector.load %arg3[%c0_147, %c0_148] : memref<8x8xf32, #tpu.memory_space<vmem>>, vector<8x8xf32>
    %cst_149 = arith.constant dense<0.000000e+00> : vector<8x512xf32>
    %198 = tpu.matmul %197, %0, %cst_149 {dimension_numbers = #tpu.dot_dimension_numbers<[1], [0], [0], [1], [0, 0, 1, 1], [], []>} : vector<8x8xf32>, vector<8x512xf32>, vector<8x512xf32> -> vector<8x512xf32>
    %c0_150 = arith.constant 0 : index
    %c0_151 = arith.constant 0 : index
    %199 = vector.load %arg10[%c0_150, %c0_151] : memref<8x1xf32, #tpu.memory_space<vmem>>, vector<8x1xf32>
    %c0_152 = arith.constant 0 : index
    %c0_153 = arith.constant 0 : index
    %200 = vector.load %arg11[%c0_152, %c0_153] : memref<8x1xf32, #tpu.memory_space<vmem>>, vector<8x1xf32>
    %cst_154 = arith.constant dense<0.000000e+00> : vector<8xf32>
    %201 = vector.multi_reduction <add>, %198, %cst_154 [1] : vector<8x512xf32> to vector<8xf32>
    %202 = vector.shape_cast %201 : vector<8xf32> to vector<8x1xf32>
    %203 = arith.mulf %198, %198 : vector<8x512xf32>
    %cst_155 = arith.constant dense<0.000000e+00> : vector<8xf32>
    %204 = vector.multi_reduction <add>, %203, %cst_155 [1] : vector<8x512xf32> to vector<8xf32>
    %205 = vector.shape_cast %204 : vector<8xf32> to vector<8x1xf32>
    %cst_156 = arith.constant 0.001953125 : f32
    %206 = vector.broadcast %cst_156 : f32 to vector<8x1xf32>
    %207 = arith.mulf %202, %206 : vector<8x1xf32>
    %cst_157 = arith.constant 0.001953125 : f32
    %208 = vector.broadcast %cst_157 : f32 to vector<8x1xf32>
    %209 = arith.mulf %205, %208 : vector<8x1xf32>
    %210 = arith.mulf %207, %207 : vector<8x1xf32>
    %211 = arith.subf %209, %210 : vector<8x1xf32>
    %cst_158 = arith.constant 0.000000e+00 : f32
    %212 = vector.broadcast %cst_158 : f32 to vector<8x1xf32>
    %213 = arith.maximumf %211, %212 : vector<8x1xf32>
    %214 = vector.broadcast %207 : vector<8x1xf32> to vector<8x512xf32>
    %215 = arith.subf %198, %214 : vector<8x512xf32>
    %cst_159 = arith.constant 9.99999974E-6 : f32
    %216 = vector.broadcast %cst_159 : f32 to vector<8x1xf32>
    %217 = arith.addf %213, %216 : vector<8x1xf32>
    %218 = math.rsqrt %217 : vector<8x1xf32>
    %219 = arith.mulf %218, %199 : vector<8x1xf32>
    %220 = vector.broadcast %219 : vector<8x1xf32> to vector<8x512xf32>
    %221 = arith.mulf %215, %220 : vector<8x512xf32>
    %222 = vector.broadcast %200 : vector<8x1xf32> to vector<8x512xf32>
    %223 = arith.addf %221, %222 : vector<8x512xf32>
    %224 = arith.addf %196, %223 : vector<8x512xf32>
    %cst_160 = arith.constant 0.000000e+00 : f32
    %225 = vector.broadcast %cst_160 : f32 to vector<8x512xf32>
    %226 = arith.maximumf %224, %225 : vector<8x512xf32>
    %c0_161 = arith.constant 0 : index
    %c0_162 = arith.constant 0 : index
    %227 = vector.load %arg13[%c0_161, %c0_162] : memref<8x512xf32, #tpu.memory_space<vmem>>, vector<8x512xf32>
    tpu.vector_store %arg13[%c0_161, %c0_162], %226 {strides = array<i32>} : memref<8x512xf32, #tpu.memory_space<vmem>>, vector<8x512xf32>,
    return
  }
}

</mosaic_0001>

<bundles_post_ra>
// kernel: residual_block.1
= control target key start
LH: loop header
LB: loop body
LE: loop exit
PB: predicated region body
PF: predicated region fallthrough
CT: control target
= control target key end

     0   :  { %s3482_s29 = smov 16   ;;  %v4331_v3 = vmov 0.0   ;;  %s3484_s15 = smov 17   ;;  %v3490_v5 = vmov 0   ;;  %v56_v7 = vlaneseq  ;;  %vm96_vm2 = vcmask 64512   ;;  %s4317_s0 = inlined_call_operand.vmem [shape: f32[8,512], index: 0, kind: input, shape index: {}]   ;;  %s4318_s4 = inlined_call_operand.vmem [shape: f32[8,1], index: 4, kind: input, shape index: {}]   ;;  %s4319_s12 = inlined_call_operand.vmem [shape: f32[9,8,512], index: 12, kind: input, shape index: {}]   ;;  %s4320_s1 = inlined_call_operand.vmem [shape: f32[9,8,8], index: 1, kind: input, shape index: {}]   ;;  %s4321_s6 = inlined_call_operand.vmem [shape: f32[8,1], index: 6, kind: input, shape index: {}]   ;;  %s4322_s5 = inlined_call_operand.vmem [shape: f32[8,1], index: 5, kind: input, shape index: {}]   ;;  %s4323_s7 = inlined_call_operand.vmem [shape: f32[8,1], index: 7, kind: input, shape index: {}]   ;;  %s4324_s2 = inlined_call_operand.vmem [shape: f32[9,8,8], index: 2, kind: input, shape index: {}]   ;;  %s4325_s3 = inlined_call_operand.vmem [shape: f32[8,8], index: 3, kind: input, shape index: {}]   ;;  %s4326_s8 = inlined_call_operand.vmem [shape: f32[8,1], index: 8, kind: input, shape index: {}]   ;;  %s4327_s10 = inlined_call_operand.vmem [shape: f32[8,1], index: 10, kind: input, shape index: {}]   ;;  %s4328_s11 = inlined_call_operand.vmem [shape: f32[8,1], index: 11, kind: input, shape index: {}]   ;;  %s4329_s9 = inlined_call_operand.vmem [shape: f32[8,1], index: 9, kind: input, shape index: {}]   ;;  %s4330_s13 = inlined_call_operand.vmem [shape: f32[8,512], index: 13, kind: output, shape index: {}]  }
   0x1   :  { %v3565_v0 = vld [vmem:[%s4317_s0 + $0x18] sm:$0xff]  ;;  %v3570_v1 = vld [vmem:[%s4317_s0] sm:$0xff]  ;;  %v3579_v2 = vld [vmem:[%s4317_s0 + $0x8] sm:$0xff]  ;;  %164 = vmatprep.mubr.f32.mxu0 %v4331_v3  ;;  %235 = vmatprep.mubr.f32.mxu1 %v4331_v3  ;;  %s3485_s18 = smov 15   ;;  %s3486_s19 = smov 1  }
   0x2   :  { %78 = vrot.lane.b32.xlu1 %v3565_v0, %s3482_s29  ;;  %72 = vrot.lane.b32.xlu0 %v3570_v1, %s3482_s29  ;;  %v3590_v4 = vld [vmem:[%s4317_s0 + $0x10] sm:$0xff]  ;;  %s3487_s20 = smov 127   ;;  %s3488_s21 = smov 113   ;;  %v1576_v6 = vld [vmem:[%s4318_s4] sm:$0xff]  ;;  %v3651_v8 = vand.u32 127, %v56_v7 }
   0x3   :  { %s3489_s22 = smov 112   ;;  %3470 = vset.pattern.permute.xlu0 %v3490_v5  ;;  %3471 = vset.pattern.permute.xlu1 %v3490_v5  ;;  %s3491_s23 = smov 111   ;;  %v3657_v11 = vld [vmem:[%s4319_s12 + $0x28] sm:$0xff]  ;;  %v3664_v15 = vld [vmem:[%s4319_s12 + $0x20] sm:$0xff]  ;;  %v3679_v20 = vld [vmem:[%s4319_s12 + $0x38] sm:$0xff] }
   0x4   :  { %vm80_vm0 = vcmp.lt.s32.totalorder %v3651_v8, 16  ;;  %vm58_vm1 = vcmp.lt.s32.totalorder %v3651_v8, 17  ;;  %v3673_v18 = vld [vmem:[%s4319_s12 + $0x8] sm:$0xff]  ;;  %v3684_v21 = vld [vmem:[%s4319_s12 + $0x30] sm:$0xff]  ;;  %v3707_v32 = vld [vmem:[%s4319_s12] sm:$0xff]  ;;  %vm395_vm3 = vcmp.lt.s32.totalorder %v3651_v8, 15 }
   0x5   :  { %v3382_v22 = vld [vmem:[%s4320_s1 + $0x8] sm:$0xff]  ;;  %v3702_v31 = vld [vmem:[%s4319_s12 + $0x10] sm:$0xff]  ;;  %v3712_v33 = vld [vmem:[%s4319_s12 + $0x18] sm:$0xff]  ;;  %vm568_vm4 = vcmp.lt.s32.totalorder %v3651_v8, 1  ;;  %vm892_vm5 = vcmp.lt.s32.totalorder %v3651_v8, 127  ;;  %vm1065_vm6 = vcmp.lt.s32.totalorder %v3651_v8, 113 }
   0x6   :  { %48 = vrot.lane.b32.xlu1 %v3570_v1, %s3484_s15  ;;  %74 = vrot.lane.b32.xlu0 %v3579_v2, %s3482_s29  ;;  %v71_v42 = vld [vmem:[%s4320_s1] sm:$0xff]  ;;  %v3732_v43 = vld [vmem:[%s4319_s12 + $0x48] sm:$0xff]  ;;  %vm1238_vm7 = vcmp.lt.s32.totalorder %v3651_v8, 112  ;;  %vm1411_vm8 = vcmp.lt.s32.totalorder %v3651_v8, 111 }
   0x7   :  { %v3744_v48 = vld [vmem:[%s4319_s12 + $0x50] sm:$0xff]  ;;  %v3749_v49 = vld [vmem:[%s4319_s12 + $0x40] sm:$0xff]  ;;  %v3754_v50 = vld [vmem:[%s4319_s12 + $0x58] sm:$0xff] }
   0x8   :  { %v3391_v59 = vld [vmem:[%s4320_s1 + $0x10] sm:$0xff]  ;;  %v3773_v60 = vld [vmem:[%s4319_s12 + $0x68] sm:$0xff]  ;;  %v3789_v7 = vld [vmem:[%s4319_s12 + $0x60] sm:$0xff] }
   0x9   :  { %v3170_v8 = vld [vmem:[%s4325_s3] sm:$0xff] }
   0xa   :  { %76 = vrot.lane.b32.xlu1 %v3590_v4, %s3482_s29  ;;  %50 = vrot.lane.b32.xlu0 %v3579_v2, %s3484_s15 }
   0xe   :  { %52 = vrot.lane.b32.xlu1 %v3590_v4, %s3484_s15  ;;  %54 = vrot.lane.b32.xlu0 %v3565_v0, %s3484_s15 }
  0x12   :  { %389 = vrot.lane.b32.xlu1 %v3579_v2, %s3485_s18  ;;  %387 = vrot.lane.b32.xlu0 %v3570_v1, %s3485_s18 }
  0x16   :  { %391 = vrot.lane.b32.xlu1 %v3590_v4, %s3485_s18  ;;  %393 = vrot.lane.b32.xlu0 %v3565_v0, %s3485_s18 }
  0x1a   :  { %562 = vrot.lane.b32.xlu1 %v3579_v2, %s3486_s19  ;;  %560 = vrot.lane.b32.xlu0 %v3570_v1, %s3486_s19 }
  0x1e   :  { %564 = vrot.lane.b32.xlu1 %v3590_v4, %s3486_s19  ;;  %566 = vrot.lane.b32.xlu0 %v3565_v0, %s3486_s19 }
  0x22   :  { %888 = vrot.lane.b32.xlu1 %v3590_v4, %s3487_s20  ;;  %886 = vrot.lane.b32.xlu0 %v3579_v2, %s3487_s20 }
  0x26   :  { %890 = vrot.lane.b32.xlu1 %v3565_v0, %s3487_s20  ;;  %884 = vrot.lane.b32.xlu0 %v3570_v1, %s3487_s20 }
  0x2a   :  { %1061 = vrot.lane.b32.xlu1 %v3590_v4, %s3488_s21  ;;  %1059 = vrot.lane.b32.xlu0 %v3579_v2, %s3488_s21 }
  0x2e   :  { %1063 = vrot.lane.b32.xlu1 %v3565_v0, %s3488_s21  ;;  %1057 = vrot.lane.b32.xlu0 %v3570_v1, %s3488_s21 }
  0x32   :  { %1234 = vrot.lane.b32.xlu1 %v3590_v4, %s3489_s22  ;;  %1232 = vrot.lane.b32.xlu0 %v3579_v2, %s3489_s22 }
  0x36   :  { %1236 = vrot.lane.b32.xlu1 %v3565_v0, %s3489_s22  ;;  %1230 = vrot.lane.b32.xlu0 %v3570_v1, %s3489_s22 }
  0x3a   :  { %1407 = vrot.lane.b32.xlu1 %v3590_v4, %s3491_s23  ;;  %1405 = vrot.lane.b32.xlu0 %v3579_v2, %s3491_s23 }
  0x3e   :  { %1409 = vrot.lane.b32.xlu1 %v3565_v0, %s3491_s23  ;;  %1403 = vrot.lane.b32.xlu0 %v3570_v1, %s3491_s23 }
  0x42   :  { %1579 = vperm.xlu0 %3470, %v1576_v6   ;;  %v3784_v6 = vld [vmem:[%s4319_s12 + $0x70] sm:$0xff] }
  0x74   :  { %v79_v9 = vpop.permute.xlu1 %78  ;;  %v73_v10 = vpop.permute.xlu0 %72 }
  0x75   :  { %v84_v12 = vsel %vm80_vm0, %v79_v9, %v73_v10 }
  0x76   :  { %v90_v19 = vmul.f32 %v3664_v15, %v84_v12 }
  0x78   :  { %v49_v13 = vpop.permute.xlu1 %48  ;;  %v75_v14 = vpop.permute.xlu0 %74 }
  0x79   :  { %v83_v16 = vsel %vm80_vm0, %v73_v10, %v75_v14 }
  0x7a   :  { %v91_v17 = vmul.f32 %v3657_v11, %v83_v16 }
  0x7c   :  { %v77_v23 = vpop.permute.xlu1 %76  ;;  %130 = vmatprep.subr.mxu0 %v91_v17  ;;  %v51_v24 = vpop.permute.xlu0 %50 }
  0x7d   :  { %v82_v25 = vsel %vm80_vm0, %v75_v14, %v77_v23  ;;  %v61_v26 = vsel %vm58_vm1, %v49_v13, %v51_v24  ;;  %131 = vmatpush1.msra.mxu0 %v90_v19  ;;  %v81_v27 = vsel %vm80_vm0, %v77_v23, %v79_v9  ;;  %v3794_v9 = vld [vmem:[%s4319_s12 + $0x78] sm:$0xff] }
  0x7e   :  { %v68_v28 = vmul.f32 %v3673_v18, %v61_v26  ;;  %v93_v29 = vmul.f32 %v3679_v20, %v81_v27  ;;  %v92_v30 = vmul.f32 %v3684_v21, %v82_v25  ;;  %3383 = vmatmul.mubr.msk.f32.vlgmr.msra.gmra.mxu0 %vm96_vm2, %v3382_v22  ;;  %v3398_v23 = vld [vmem:[%s4320_s1 + $0x18] sm:$0xff] }
  0x7f   :  { %309 = vmatprep.mubr.f32.mxu0 %v4331_v3 }
  0x80   :  { %201 = vmatprep.subr.mxu1 %v93_v29  ;;  %v53_v34 = vpop.permute.xlu1 %52  ;;  %275 = vmatprep.subr.mxu0 %v68_v28  ;;  %v55_v35 = vpop.permute.xlu0 %54  ;;  %v3401_v29 = vld [vmem:[%s4320_s1 + $0x20] sm:$0xff] }
  0x81   :  { %v60_v36 = vsel %vm58_vm1, %v51_v24, %v53_v34  ;;  %v59_v37 = vsel %vm58_vm1, %v53_v34, %v55_v35  ;;  %v62_v38 = vsel %vm58_vm1, %v55_v35, %v49_v13  ;;  %202 = vmatpush1.msra.mxu1 %v92_v30  ;;  %v3813_v24 = vld [vmem:[%s4319_s12 + $0xa8] sm:$0xff]  ;;  %v3828_v30 = vld [vmem:[%s4319_s12 + $0xb0] sm:$0xff]  ;;  %v3834_v34 = vld [vmem:[%s4319_s12 + $0xa0] sm:$0xff] }
  0x82   :  { %v69_v39 = vmul.f32 %v3702_v31, %v60_v36  ;;  %v67_v40 = vmul.f32 %v3707_v32, %v62_v38  ;;  %v70_v41 = vmul.f32 %v3712_v33, %v59_v37  ;;  %3384 = vmatmul.mubr.msk.f32.vlgmr.msra.gmra.mxu1 %vm96_vm2, %v3382_v22 }
  0x83   :  { %380 = vmatprep.mubr.f32.mxu1 %v4331_v3 }
  0x84   :  { %v390_v44 = vpop.permute.xlu1 %389  ;;  %276 = vmatpush1.msra.mxu0 %v67_v40  ;;  %346 = vmatprep.subr.mxu1 %v70_v41  ;;  %v388_v45 = vpop.permute.xlu0 %387 }
  0x85   :  { %v398_v46 = vsel %vm395_vm3, %v388_v45, %v390_v44  ;;  %347 = vmatpush1.msra.mxu1 %v69_v39  ;;  %3385 = vmatmul.mubr.msk.f32.vlgmr.msra.gmra.mxu0 %vm96_vm2, %v71_v42 }
  0x86   :  { %v406_v47 = vmul.f32 %v3732_v43, %v398_v46  ;;  %3386 = vmatmul.mubr.msk.f32.vlgmr.msra.gmra.mxu1 %vm96_vm2, %v71_v42  ;;  %478 = vmatprep.mubr.f32.mxu0 %v4331_v3 }
  0x87   :  { %549 = vmatprep.mubr.f32.mxu1 %v4331_v3 }
  0x88   :  { %v392_v51 = vpop.permute.xlu1 %391  ;;  %444 = vmatprep.subr.mxu0 %v406_v47  ;;  %v394_v52 = vpop.permute.xlu0 %393  ;;  %v3875_v47 = vld [vmem:[%s4319_s12 + $0xd0] sm:$0xff] }
  0x89   :  { %v397_v53 = vsel %vm395_vm3, %v390_v44, %v392_v51  ;;  %v396_v54 = vsel %vm395_vm3, %v392_v51, %v394_v52  ;;  %v399_v55 = vsel %vm395_vm3, %v394_v52, %v388_v45  ;;  %v3880_v51 = vld [vmem:[%s4319_s12 + $0xc0] sm:$0xff]  ;;  %v3885_v52 = vld [vmem:[%s4319_s12 + $0xd8] sm:$0xff] }
  0x8a   :  { %v407_v56 = vmul.f32 %v3744_v48, %v397_v53  ;;  %v405_v57 = vmul.f32 %v3749_v49, %v399_v55  ;;  %v408_v58 = vmul.f32 %v3754_v50, %v396_v54 }
  0x8c   :  { %v563_v61 = vpop.permute.xlu1 %562  ;;  %445 = vmatpush1.msra.mxu0 %v405_v57  ;;  %515 = vmatprep.subr.mxu1 %v408_v58  ;;  %v561_v62 = vpop.permute.xlu0 %560 }
  0x8d   :  { %v571_v63 = vsel %vm568_vm4, %v561_v62, %v563_v61  ;;  %516 = vmatpush1.msra.mxu1 %v407_v56  ;;  %3392 = vmatmul.mubr.msk.f32.vlgmr.msra.gmra.mxu0 %vm96_vm2, %v3391_v59 }
  0x8e   :  { %v579_v5 = vmul.f32 %v3773_v60, %v571_v63  ;;  %3393 = vmatmul.mubr.msk.f32.vlgmr.msra.gmra.mxu1 %vm96_vm2, %v3391_v59  ;;  %651 = vmatprep.mubr.f32.mxu0 %v4331_v3  ;;  %v3904_v63 = vld [vmem:[%s4319_s12 + $0xe8] sm:$0xff] }
  0x8f   :  { %722 = vmatprep.mubr.f32.mxu1 %v4331_v3  ;;  %4341 = vst [vmem:[#allocation2_spill] sm:$0xff] %v3904_v63 }
  0x90   :  { %v565_v10 = vpop.permute.xlu1 %564  ;;  %617 = vmatprep.subr.mxu0 %v579_v5  ;;  %v567_v12 = vpop.permute.xlu0 %566 }
  0x91   :  { %v570_v13 = vsel %vm568_vm4, %v563_v61, %v565_v10  ;;  %v569_v14 = vsel %vm568_vm4, %v565_v10, %v567_v12  ;;  %v572_v16 = vsel %vm568_vm4, %v567_v12, %v561_v62  ;;  %v3415_v62 = vld [vmem:[%s4320_s1 + $0x30] sm:$0xff] }
  0x92   :  { %v580_v17 = vmul.f32 %v3784_v6, %v570_v13  ;;  %v578_v19 = vmul.f32 %v3789_v7, %v572_v16  ;;  %v581_v22 = vmul.f32 %v3794_v9, %v569_v14  ;;  %v3915_v14 = vld [vmem:[%s4319_s12 + $0xf0] sm:$0xff]  ;;  %v3920_v16 = vld [vmem:[%s4319_s12 + $0xe0] sm:$0xff] }
  0x93   :  { %4342 = vst [vmem:[#allocation3_spill] sm:$0xff] %v3915_v14  ;;  %4343 = vst [vmem:[#allocation4_spill] sm:$0xff] %v3920_v16 }
  0x94   :  { %v889_v25 = vpop.permute.xlu1 %888  ;;  %618 = vmatpush1.msra.mxu0 %v578_v19  ;;  %688 = vmatprep.subr.mxu1 %v581_v22  ;;  %v887_v26 = vpop.permute.xlu0 %886 }
  0x95   :  { %v894_v27 = vsel %vm892_vm5, %v887_v26, %v889_v25  ;;  %3399 = vmatmul.mubr.msk.f32.vlgmr.msra.gmra.mxu0 %vm96_vm2, %v3398_v23  ;;  %689 = vmatpush1.msra.mxu1 %v580_v17  ;;  %v3925_v17 = vld [vmem:[%s4319_s12 + $0xf8] sm:$0xff] }
  0x96   :  { %v903_v28 = vmul.f32 %v3813_v24, %v894_v27  ;;  %768 = vmatprep.subr.mxu0 %v3579_v2  ;;  %3400 = vmatmul.mubr.msk.f32.vlgmr.msra.gmra.mxu1 %vm96_vm2, %v3398_v23  ;;  %v3839_v2 = vld [vmem:[%s4319_s12 + $0xb8] sm:$0xff]  ;;  %4344 = vst [vmem:[#allocation5_spill] sm:$0xff] %v3925_v17 }
  0x97   :  { %769 = vmatpush1.msra.mxu0 %v3570_v1  ;;  %802 = vmatprep.mubr.f32.mxu0 %v4331_v3 }
  0x98   :  { %v891_v35 = vpop.permute.xlu1 %890  ;;  %941 = vmatprep.subr.mxu0 %v903_v28  ;;  %v885_v1 = vpop.permute.xlu0 %884  ;;  %839 = vmatprep.subr.mxu1 %v3565_v0  ;;  %v3408_v0 = vld [vmem:[%s4320_s1 + $0x28] sm:$0xff] }
  0x99   :  { %v893_v36 = vsel %vm892_vm5, %v889_v25, %v891_v35  ;;  %v895_v37 = vsel %vm892_vm5, %v885_v1, %v887_v26  ;;  %v896_v38 = vsel %vm892_vm5, %v891_v35, %v885_v1  ;;  %3402 = vmatmul.mubr.msk.f32.vlgmr.msra.gmra.mxu0 %vm96_vm2, %v3401_v29  ;;  %840 = vmatpush1.msra.mxu1 %v3590_v4  ;;  %v3863_v4 = vld [vmem:[%s4319_s12 + $0xc8] sm:$0xff]  ;;  %v3422_v35 = vld [vmem:[%s4320_s1 + $0x38] sm:$0xff] }
  0x9a   :  { %v904_v39 = vmul.f32 %v3828_v30, %v893_v36  ;;  %v902_v40 = vmul.f32 %v3834_v34, %v895_v37  ;;  %v905_v41 = vmul.f32 %v3839_v2, %v896_v38  ;;  %873 = vmatprep.mubr.f32.mxu1 %v4331_v3  ;;  %975 = vmatprep.mubr.f32.mxu0 %v4331_v3  ;;  %v3944_v1 = vld [vmem:[%s4319_s12 + $0x108] sm:$0xff] }
  0x9b   :  { %3403 = vmatmul.mubr.msk.f32.vlgmr.msra.gmra.mxu1 %vm96_vm2, %v3401_v29  ;;  %4345 = vst [vmem:[#allocation6_spill] sm:$0xff] %v3944_v1 }
  0x9c   :  { %v1062_v42 = vpop.permute.xlu1 %1061  ;;  %942 = vmatpush1.msra.mxu0 %v902_v40  ;;  %1012 = vmatprep.subr.mxu1 %v905_v41  ;;  %v1060_v44 = vpop.permute.xlu0 %1059  ;;  %v3955_v40 = vld [vmem:[%s4319_s12 + $0x110] sm:$0xff]  ;;  %v3960_v41 = vld [vmem:[%s4319_s12 + $0x100] sm:$0xff] }
  0x9d   :  { %v1067_v45 = vsel %vm1065_vm6, %v1060_v44, %v1062_v42  ;;  %3409 = vmatmul.mubr.msk.f32.vlgmr.msra.gmra.mxu0 %vm96_vm2, %v3408_v0  ;;  %1013 = vmatpush1.msra.mxu1 %v904_v39  ;;  %4346 = vst [vmem:[#allocation7_spill] sm:$0xff] %v3955_v40  ;;  %4347 = vst [vmem:[#allocation8_spill] sm:$0xff] %v3960_v41 }
  0x9e   :  { %v1076_v46 = vmul.f32 %v3863_v4, %v1067_v45  ;;  %1046 = vmatprep.mubr.f32.mxu1 %v4331_v3  ;;  %1148 = vmatprep.mubr.f32.mxu0 %v4331_v3 }
  0x9f   :  { %3410 = vmatmul.mubr.msk.f32.vlgmr.msra.gmra.mxu1 %vm96_vm2, %v3408_v0  ;;  %v3965_v0 = vld [vmem:[%s4319_s12 + $0x118] sm:$0xff] }
  0xa0   :  { %v1064_v53 = vpop.permute.xlu1 %1063  ;;  %1114 = vmatprep.subr.mxu0 %v1076_v46  ;;  %v1058_v54 = vpop.permute.xlu0 %1057  ;;  %1219 = vmatprep.mubr.f32.mxu1 %v4331_v3  ;;  %4348 = vst [vmem:[#allocation9_spill] sm:$0xff] %v3965_v0 }
  0xa1   :  { %v1066_v55 = vsel %vm1065_vm6, %v1062_v42, %v1064_v53  ;;  %v1068_v56 = vsel %vm1065_vm6, %v1058_v54, %v1060_v44  ;;  %v1069_v57 = vsel %vm1065_vm6, %v1064_v53, %v1058_v54 }
  0xa2   :  { %v1077_v58 = vmul.f32 %v3875_v47, %v1066_v55  ;;  %v1075_v59 = vmul.f32 %v3880_v51, %v1068_v56  ;;  %v1078_v61 = vmul.f32 %v3885_v52, %v1069_v57  ;;  %v3429_v57 = vld [vmem:[%s4320_s1 + $0x40] sm:$0xff] }
  0xa4   :  { %v1235_v5 = vpop.permute.xlu1 %1234  ;;  %1115 = vmatpush1.msra.mxu0 %v1075_v59  ;;  %1185 = vmatprep.subr.mxu1 %v1078_v61  ;;  %v1233_v10 = vpop.permute.xlu0 %1232 }
  0xa5   :  { %v1240_v12 = vsel %vm1238_vm7, %v1233_v10, %v1235_v5  ;;  %3416 = vmatmul.mubr.msk.f32.vlgmr.msra.gmra.mxu0 %vm96_vm2, %v3415_v62  ;;  %1186 = vmatpush1.msra.mxu1 %v1077_v58 }
  0xa6   :  { %v1249_v13 = vmul.f32 %v3904_v63, %v1240_v12  ;;  %3417 = vmatmul.mubr.msk.f32.vlgmr.msra.gmra.mxu1 %vm96_vm2, %v3415_v62  ;;  %1321 = vmatprep.mubr.f32.mxu0 %v4331_v3 }
  0xa7   :  { %1392 = vmatprep.mubr.f32.mxu1 %v4331_v3 }
  0xa8   :  { %v1237_v19 = vpop.permute.xlu1 %1236  ;;  %1287 = vmatprep.subr.mxu0 %v1249_v13  ;;  %v1231_v22 = vpop.permute.xlu0 %1230 }
  0xa9   :  { %v1239_v23 = vsel %vm1238_vm7, %v1235_v5, %v1237_v19  ;;  %v1241_v25 = vsel %vm1238_vm7, %v1231_v22, %v1233_v10  ;;  %v1242_v26 = vsel %vm1238_vm7, %v1237_v19, %v1231_v22 }
  0xaa   :  { %v1250_v27 = vmul.f32 %v3915_v14, %v1239_v23  ;;  %v1248_v28 = vmul.f32 %v3920_v16, %v1241_v25  ;;  %v1251_v29 = vmul.f32 %v3925_v17, %v1242_v26 }
  0xac   :  { %v1408_v36 = vpop.permute.xlu1 %1407  ;;  %1288 = vmatpush1.msra.mxu0 %v1248_v28  ;;  %1358 = vmatprep.subr.mxu1 %v1251_v29  ;;  %v1406_v37 = vpop.permute.xlu0 %1405 }
  0xad   :  { %v1413_v38 = vsel %vm1411_vm8, %v1406_v37, %v1408_v36  ;;  %3423 = vmatmul.mubr.msk.f32.vlgmr.msra.gmra.mxu0 %vm96_vm2, %v3422_v35  ;;  %1359 = vmatpush1.msra.mxu1 %v1250_v27 }
  0xae   :  { %v1422_v39 = vmul.f32 %v3944_v1, %v1413_v38  ;;  %3424 = vmatmul.mubr.msk.f32.vlgmr.msra.gmra.mxu1 %vm96_vm2, %v3422_v35  ;;  %1494 = vmatprep.mubr.f32.mxu0 %v4331_v3 }
  0xaf   :  { %1565 = vmatprep.mubr.f32.mxu1 %v4331_v3 }
  0xb0   :  { %v1410_v42 = vpop.permute.xlu1 %1409  ;;  %1460 = vmatprep.subr.mxu0 %v1422_v39  ;;  %v1404_v44 = vpop.permute.xlu0 %1403 }
  0xb1   :  { %v1412_v45 = vsel %vm1411_vm8, %v1408_v36, %v1410_v42  ;;  %v1414_v46 = vsel %vm1411_vm8, %v1404_v44, %v1406_v37  ;;  %v1415_v53 = vsel %vm1411_vm8, %v1410_v42, %v1404_v44 }
  0xb2   :  { %v1423_v54 = vmul.f32 %v3955_v40, %v1412_v45  ;;  %v1421_v55 = vmul.f32 %v3960_v41, %v1414_v46  ;;  %v1424_v56 = vmul.f32 %v3965_v0, %v1415_v53 }
  0xb4   :  { %1461 = vmatpush1.msra.mxu0 %v1421_v55  ;;  %1531 = vmatprep.subr.mxu1 %v1424_v56 }
  0xb5   :  { %3430 = vmatmul.mubr.msk.f32.vlgmr.msra.gmra.mxu0 %vm96_vm2, %v3429_v57  ;;  %1532 = vmatpush1.msra.mxu1 %v1423_v54 }
  0xb6   :  { %3431 = vmatmul.mubr.msk.f32.vlgmr.msra.gmra.mxu1 %vm96_vm2, %v3429_v57  ;;  %1738 = vmatprep.mubr.f32.mxu0 %v4331_v3 }
  0xb7   :  { %1809 = vmatprep.mubr.f32.mxu1 %v4331_v3 }
 0x13e   :  { %v166_v58 = vpop.f32.mrf.mxu0 }
 0x140   :  { %v168_v59 = vpop.f32.mrf.mxu0 }
 0x142   :  { %v237_v61 = vpop.f32.mrf.mxu1 }
 0x144   :  { %v239_v62 = vpop.f32.mrf.mxu1 }
 0x145   :  { %v311_v5 = vpop.f32.mrf.mxu0 }
 0x146   :  { %v382_v10 = vpop.f32.mrf.mxu1  ;;  %v312_v38 = vadd.f32 %v311_v5, %v166_v58 }
 0x147   :  { %v313_v12 = vpop.f32.mrf.mxu0  ;;  %v383_v42 = vadd.f32 %v382_v10, %v237_v61 }
 0x148   :  { %v384_v13 = vpop.f32.mrf.mxu1  ;;  %v314_v46 = vadd.f32 %v313_v12, %v168_v59 }
 0x149   :  { %v385_v44 = vadd.f32 %v384_v13, %v239_v62 }
 0x14d   :  { %v480_v19 = vpop.f32.mrf.mxu0 }
 0x14e   :  { %v551_v22 = vpop.f32.mrf.mxu1  ;;  %v556_v53 = vadd.f32 %v480_v19, %v312_v38 }
 0x14f   :  { %v482_v23 = vpop.f32.mrf.mxu0  ;;  %v558_v55 = vadd.f32 %v551_v22, %v383_v42 }
 0x150   :  { %v553_v25 = vpop.f32.mrf.mxu1  ;;  %v557_v3 = vadd.f32 %v482_v23, %v314_v46 }
 0x151   :  { %v559_v56 = vadd.f32 %v553_v25, %v385_v44 }
 0x155   :  { %v653_v26 = vpop.f32.mrf.mxu0 }
 0x156   :  { %v724_v27 = vpop.f32.mrf.mxu1  ;;  %v729_v0 = vadd.f32 %v653_v26, %v556_v53 }
 0x157   :  { %v655_v28 = vpop.f32.mrf.mxu0  ;;  %v731_v41 = vadd.f32 %v724_v27, %v558_v55 }
 0x158   :  { %v726_v29 = vpop.f32.mrf.mxu1  ;;  %v730_v16 = vadd.f32 %v655_v28, %v557_v3 }
 0x159   :  { %v804_v35 = vpop.f32.mrf.mxu0  ;;  %v732_v14 = vadd.f32 %v726_v29, %v559_v56 }
 0x15a   :  { %v880_v63 = vadd.f32 %v804_v35, %v729_v0 }
 0x15b   :  { %v875_v36 = vpop.f32.mrf.mxu1  ;;  %v806_v37 = vpop.f32.mrf.mxu0 }
 0x15c   :  { %v882_v58 = vadd.f32 %v875_v36, %v731_v41  ;;  %v881_v59 = vadd.f32 %v806_v37, %v730_v16  ;;  %v1580_v41 = vpop.permute.xlu0 %1579 }
 0x15d   :  { %v877_v39 = vpop.f32.mrf.mxu1  ;;  %v977_v45 = vpop.f32.mrf.mxu0 }
 0x15e   :  { %v883_v62 = vadd.f32 %v877_v39, %v732_v14  ;;  %v1053_v12 = vadd.f32 %v977_v45, %v880_v63 }
 0x15f   :  { %v1048_v54 = vpop.f32.mrf.mxu1  ;;  %v979_v57 = vpop.f32.mrf.mxu0 }
 0x160   :  { %v1055_v19 = vadd.f32 %v1048_v54, %v882_v58  ;;  %v1054_v22 = vadd.f32 %v979_v57, %v881_v59  ;;  %v1587_v59 = vld [vmem:[%s4321_s6] sm:$0xff] }
 0x161   :  { %v1050_v40 = vpop.f32.mrf.mxu1 }
 0x162   :  { %v1056_v23 = vadd.f32 %v1050_v40, %v883_v62 }
 0x165   :  { %v1150_v1 = vpop.f32.mrf.mxu0 }
 0x166   :  { %v1221_v17 = vpop.f32.mrf.mxu1  ;;  %v1226_v25 = vadd.f32 %v1150_v1, %v1053_v12 }
 0x167   :  { %v1152_v5 = vpop.f32.mrf.mxu0  ;;  %v1228_v26 = vadd.f32 %v1221_v17, %v1055_v19 }
 0x168   :  { %v1223_v61 = vpop.f32.mrf.mxu1  ;;  %v1227_v27 = vadd.f32 %v1152_v5, %v1054_v22 }
 0x169   :  { %v1229_v29 = vadd.f32 %v1223_v61, %v1056_v23 }
 0x16d   :  { %v1323_v10 = vpop.f32.mrf.mxu0 }
 0x16e   :  { %v1394_v13 = vpop.f32.mrf.mxu1  ;;  %v1399_v42 = vadd.f32 %v1323_v10, %v1226_v25 }
 0x16f   :  { %v1325_v38 = vpop.f32.mrf.mxu0  ;;  %v1401_v3 = vadd.f32 %v1394_v13, %v1228_v26 }
 0x170   :  { %v1396_v44 = vpop.f32.mrf.mxu1  ;;  %v1400_v28 = vadd.f32 %v1325_v38, %v1227_v27  ;;  %v1586_v27 = vld [vmem:[%s4322_s5] sm:$0xff] }
 0x171   :  { %v1402_v36 = vadd.f32 %v1396_v44, %v1229_v29 }
 0x175   :  { %v1496_v0 = vpop.f32.mrf.mxu0 }
 0x176   :  { %v1572_v35 = vadd.f32 %v1496_v0, %v1399_v42  ;;  %v1567_v14 = vpop.f32.mrf.mxu1 }
 0x177   :  { %v1574_v16 = vadd.f32 %v1567_v14, %v1401_v3  ;;  %v1498_v63 = vpop.f32.mrf.mxu0 }
 0x178   :  { %v1573_v37 = vadd.f32 %v1498_v63, %v1400_v28  ;;  %v1582_v39 = vadd.f32 %v1580_v41, %v1572_v35  ;;  %v1569_v45 = vpop.f32.mrf.mxu1 }
 0x179   :  { %v1575_v1 = vadd.f32 %v1569_v45, %v1402_v36  ;;  %v1584_v17 = vadd.f32 %v1580_v41, %v1574_v16 }
 0x17a   :  { %v1583_v40 = vadd.f32 %v1580_v41, %v1573_v37  ;;  %v1593_v54 = vmul.f32 %v1582_v39, %v1582_v39 }
 0x17b   :  { %v1585_v46 = vadd.f32 %v1580_v41, %v1575_v1  ;;  %v1595_v57 = vmul.f32 %v1584_v17, %v1584_v17 }
 0x17c   :  { %v1588_v53 = vadd.f32 %v1583_v40, %v1582_v39  ;;  %v1594_v55 = vmul.f32 %v1583_v40, %v1583_v40 }
 0x17d   :  { %v1596_v61 = vmul.f32 %v1585_v46, %v1585_v46 }
 0x17e   :  { %v1589_v56 = vadd.f32 %v1588_v53, %v1584_v17  ;;  %v1597_v58 = vadd.f32 %v1594_v55, %v1593_v54  ;;  %v3114_v54 = vld [vmem:[%s4323_s7] sm:$0xff] }
 0x180   :  { %v1590_v5 = vadd.f32 %v1589_v56, %v1585_v46  ;;  %v1598_v62 = vadd.f32 %v1597_v58, %v1595_v57 }
 0x182   :  { %1591 = vadd.xlane.f32.xlu1 %v1590_v5  ;;  %v1599_v10 = vadd.f32 %v1598_v62, %v1596_v61 }
 0x184   :  { %1600 = vadd.xlane.f32.xlu0 %v1599_v10 }
 0x19a   :  { %1625 = vperm.xlu0 %3470, %v1587_v59   ;;  %v3432_v59 = vld [vmem:[%s4324_s2 + $0x8] sm:$0xff] }
 0x20b   :  { %v1592_v12 = vpop.xlane.xlu1 %1591 }
 0x20c   :  { %v1602_v13 = vmul.f32 0.001953125, %v1592_v12 }
 0x20d   :  { %v1601_v19 = vpop.xlane.xlu0 %1600 }
 0x20e   :  { %v1603_v22 = vmul.f32 0.001953125, %v1601_v19  ;;  %v1604_v25 = vmul.f32 %v1602_v13, %v1602_v13  ;;  %v1607_v29 = vsub.f32 %v1582_v39, %v1602_v13  ;;  %v1608_v3 = vsub.f32 %v1583_v40, %v1602_v13 }
 0x20f   :  { %v1610_v0 = vsub.f32 %v1585_v46, %v1602_v13  ;;  %v1609_v53 = vsub.f32 %v1584_v17, %v1602_v13 }
 0x210   :  { %v1605_v23 = vsub.f32 %v1603_v22, %v1604_v25 }
 0x212   :  { %v1606_v26 = vmax.f32 %v1605_v23, 0.0  ;;  %v1652_v23 = vld [vmem:[%s4324_s2] sm:$0xff] }
 0x214   :  { %v1611_v38 = vadd.f32 1e-05, %v1606_v26 }
 0x215   :  { %v1626_v36 = vpop.permute.xlu0 %1625 }
 0x216   :  { %3472 = vrsqrt.f32 %v1611_v38 }
 0x223   :  { %v3473_v42 = vpop.eup %3472 }
 0x224   :  { %v1613_v44 = vmul.f32 %v3473_v42, %v1586_v27 }
 0x226   :  { %1616 = vperm.xlu1 %3471, %v1613_v44  }
 0x2a1   :  { %v1617_v41 = vpop.permute.xlu1 %1616 }
 0x2a2   :  { %v1619_v28 = vmul.f32 %v1617_v41, %v1607_v29  ;;  %v1620_v35 = vmul.f32 %v1617_v41, %v1608_v3  ;;  %v1622_v14 = vmul.f32 %v1617_v41, %v1610_v0  ;;  %v1621_v39 = vmul.f32 %v1617_v41, %v1609_v53 }
 0x2a4   :  { %v1628_v16 = vadd.f32 %v1626_v36, %v1619_v28  ;;  %v1631_v63 = vadd.f32 %v1626_v36, %v1622_v14  ;;  %v1629_v37 = vadd.f32 %v1626_v36, %v1620_v35  ;;  %v1630_v46 = vadd.f32 %v1626_v36, %v1621_v39 }
 0x2a6   :  { %v3990_v45 = vmax.f32 %v1628_v16, 0.0  ;;  %v3992_v1 = vmax.f32 %v1631_v63, 0.0  ;;  %v3998_v40 = vmax.f32 %v1629_v37, 0.0  ;;  %v4008_v17 = vmax.f32 %v1630_v46, 0.0 }
 0x2a8   :  { %1659 = vrot.lane.b32.xlu0 %v3992_v1, %s3482_s29  ;;  %1653 = vrot.lane.b32.xlu1 %v3990_v45, %s3482_s29 }
 0x2ac   :  { %1638 = vrot.lane.b32.xlu0 %v3998_v40, %s3484_s15  ;;  %1655 = vrot.lane.b32.xlu1 %v3998_v40, %s3482_s29 }
 0x2b0   :  { %1642 = vrot.lane.b32.xlu0 %v3992_v1, %s3484_s15  ;;  %1636 = vrot.lane.b32.xlu1 %v3990_v45, %s3484_s15 }
 0x2b4   :  { %1961 = vrot.lane.b32.xlu0 %v3990_v45, %s3485_s18  ;;  %1657 = vrot.lane.b32.xlu1 %v4008_v17, %s3482_s29 }
 0x2b8   :  { %1967 = vrot.lane.b32.xlu0 %v3992_v1, %s3485_s18  ;;  %1640 = vrot.lane.b32.xlu1 %v4008_v17, %s3484_s15 }
 0x2bc   :  { %2128 = vrot.lane.b32.xlu0 %v3990_v45, %s3486_s19  ;;  %1963 = vrot.lane.b32.xlu1 %v3998_v40, %s3485_s18 }
 0x2c0   :  { %2134 = vrot.lane.b32.xlu0 %v3992_v1, %s3486_s19  ;;  %1965 = vrot.lane.b32.xlu1 %v4008_v17, %s3485_s18 }
 0x2c4   :  { %2448 = vrot.lane.b32.xlu0 %v3998_v40, %s3487_s20  ;;  %2130 = vrot.lane.b32.xlu1 %v3998_v40, %s3486_s19 }
 0x2c8   :  { %2446 = vrot.lane.b32.xlu0 %v3990_v45, %s3487_s20  ;;  %2132 = vrot.lane.b32.xlu1 %v4008_v17, %s3486_s19 }
 0x2cc   :  { %2615 = vrot.lane.b32.xlu0 %v3998_v40, %s3488_s21  ;;  %2450 = vrot.lane.b32.xlu1 %v4008_v17, %s3487_s20 }
 0x2d0   :  { %2613 = vrot.lane.b32.xlu0 %v3990_v45, %s3488_s21  ;;  %2452 = vrot.lane.b32.xlu1 %v3992_v1, %s3487_s20 }
 0x2d4   :  { %2782 = vrot.lane.b32.xlu0 %v3998_v40, %s3489_s22  ;;  %2617 = vrot.lane.b32.xlu1 %v4008_v17, %s3488_s21 }
 0x2d8   :  { %2780 = vrot.lane.b32.xlu0 %v3990_v45, %s3489_s22  ;;  %2619 = vrot.lane.b32.xlu1 %v3992_v1, %s3488_s21 }
 0x2dc   :  { %2949 = vrot.lane.b32.xlu0 %v3998_v40, %s3491_s23  ;;  %2784 = vrot.lane.b32.xlu1 %v4008_v17, %s3489_s22 }
 0x2e0   :  { %2947 = vrot.lane.b32.xlu0 %v3990_v45, %s3491_s23  ;;  %2786 = vrot.lane.b32.xlu1 %v3992_v1, %s3489_s22 }
 0x2e4   :  { %3117 = vperm.xlu0 %3470, %v3114_v54   ;;  %2951 = vrot.lane.b32.xlu1 %v4008_v17, %s3491_s23 }
 0x2e8   :  { %2953 = vrot.lane.b32.xlu1 %v3992_v1, %s3491_s23 }
 0x31a   :  { %v1660_v55 = vpop.permute.xlu0 %1659  ;;  %v1654_v56 = vpop.permute.xlu1 %1653 }
 0x31b   :  { %v1664_v57 = vsel %vm80_vm0, %v1660_v55, %v1654_v56 }
 0x31c   :  { %v1665_v10 = vmul.f32 %v3664_v15, %v1664_v57  ;;  %v4349_v15 = vmov 0.0  }
 0x31e   :  { %v1639_v58 = vpop.permute.xlu0 %1638  ;;  %v1656_v5 = vpop.permute.xlu1 %1655 }
 0x31f   :  { %v1663_v61 = vsel %vm80_vm0, %v1654_v56, %v1656_v5 }
 0x320   :  { %v1666_v62 = vmul.f32 %v3657_v11, %v1663_v61 }
 0x322   :  { %v1643_v12 = vpop.permute.xlu0 %1642  ;;  %1704 = vmatprep.subr.mxu0 %v1666_v62  ;;  %v1637_v13 = vpop.permute.xlu1 %1636 }
 0x323   :  { %v1646_v19 = vsel %vm58_vm1, %v1637_v13, %v1639_v58  ;;  %v1647_v22 = vsel %vm58_vm1, %v1643_v12, %v1637_v13  ;;  %1705 = vmatpush1.msra.mxu0 %v1665_v10 }
 0x324   :  { %v1648_v25 = vmul.f32 %v1647_v22, %v3707_v32  ;;  %v1649_v11 = vmul.f32 %v1646_v19, %v3673_v18  ;;  %3433 = vmatmul.mubr.msk.f32.vlgmr.msra.gmra.mxu0 %vm96_vm2, %v3432_v59  ;;  %v3446_v19 = vld [vmem:[%s4324_s2 + $0x28] sm:$0xff] }
 0x325   :  { %1883 = vmatprep.mubr.f32.mxu0 %v4349_v15 }
 0x326   :  { %v1962_v26 = vpop.permute.xlu0 %1961  ;;  %1849 = vmatprep.subr.mxu0 %v1649_v11  ;;  %v1658_v38 = vpop.permute.xlu1 %1657 }
 0x327   :  { %v1661_v27 = vsel %vm80_vm0, %v1658_v38, %v1660_v55  ;;  %v1662_v42 = vsel %vm80_vm0, %v1656_v5, %v1658_v38  ;;  %1850 = vmatpush1.msra.mxu0 %v1648_v25 }
 0x328   :  { %v1667_v18 = vmul.f32 %v3684_v21, %v1662_v42  ;;  %v1668_v32 = vmul.f32 %v3679_v20, %v1661_v27  ;;  %3435 = vmatmul.mubr.msk.f32.vlgmr.msra.gmra.mxu0 %vm96_vm2, %v1652_v23 }
 0x329   :  { %2046 = vmatprep.mubr.f32.mxu0 %v4349_v15 }
 0x32a   :  { %v1968_v44 = vpop.permute.xlu0 %1967  ;;  %1775 = vmatprep.subr.mxu1 %v1668_v32  ;;  %v1641_v29 = vpop.permute.xlu1 %1640 }
 0x32b   :  { %v1644_v3 = vsel %vm58_vm1, %v1641_v29, %v1643_v12  ;;  %v1645_v0 = vsel %vm58_vm1, %v1639_v58, %v1641_v29  ;;  %1776 = vmatpush1.msra.mxu1 %v1667_v18  ;;  %v1972_v20 = vsel %vm395_vm3, %v1968_v44, %v1962_v26 }
 0x32c   :  { %v1650_v41 = vmul.f32 %v1645_v0, %v3702_v31  ;;  %v1651_v21 = vmul.f32 %v1644_v3, %v3712_v33  ;;  %3434 = vmatmul.mubr.msk.f32.vlgmr.msra.gmra.mxu1 %vm96_vm2, %v3432_v59  ;;  %v1973_v31 = vmul.f32 %v3749_v49, %v1972_v20  ;;  %v3437_v33 = vld [vmem:[%s4324_s2 + $0x10] sm:$0xff]  ;;  %v4350_v0 = vld [vmem:[#allocation2_spill] sm:$0xff] }
 0x32d   :  { %1954 = vmatprep.mubr.f32.mxu1 %v4349_v15 }
 0x32e   :  { %v2129_v28 = vpop.permute.xlu0 %2128  ;;  %1920 = vmatprep.subr.mxu1 %v1651_v21  ;;  %v1964_v35 = vpop.permute.xlu1 %1963  ;;  %v3452_v21 = vld [vmem:[%s4324_s2 + $0x38] sm:$0xff] }
 0x32f   :  { %v1971_v14 = vsel %vm395_vm3, %v1962_v26, %v1964_v35  ;;  %1921 = vmatpush1.msra.mxu1 %v1650_v41  ;;  %v3449_v26 = vld [vmem:[%s4324_s2 + $0x30] sm:$0xff] }
 0x330   :  { %v1974_v36 = vmul.f32 %v3732_v43, %v1971_v14  ;;  %3436 = vmatmul.mubr.msk.f32.vlgmr.msra.gmra.mxu1 %vm96_vm2, %v1652_v23 }
 0x331   :  { %2117 = vmatprep.mubr.f32.mxu1 %v4349_v15 }
 0x332   :  { %v2135_v16 = vpop.permute.xlu0 %2134  ;;  %2012 = vmatprep.subr.mxu0 %v1974_v36  ;;  %v1966_v63 = vpop.permute.xlu1 %1965  ;;  %v4352_v36 = vld [vmem:[#allocation3_spill] sm:$0xff] }
 0x333   :  { %v1969_v37 = vsel %vm395_vm3, %v1966_v63, %v1968_v44  ;;  %v1970_v53 = vsel %vm395_vm3, %v1964_v35, %v1966_v63  ;;  %2013 = vmatpush1.msra.mxu0 %v1973_v31  ;;  %v2139_v39 = vsel %vm568_vm4, %v2135_v16, %v2129_v28 }
 0x334   :  { %v1975_v43 = vmul.f32 %v3744_v48, %v1970_v53  ;;  %v1976_v49 = vmul.f32 %v3754_v50, %v1969_v37  ;;  %3438 = vmatmul.mubr.msk.f32.vlgmr.msra.gmra.mxu0 %vm96_vm2, %v3437_v33  ;;  %v2140_v48 = vmul.f32 %v3789_v7, %v2139_v39  ;;  %v3440_v50 = vld [vmem:[%s4324_s2 + $0x18] sm:$0xff]  ;;  %v4355_v39 = vld [vmem:[#allocation8_spill] sm:$0xff] }
 0x335   :  { %2213 = vmatprep.mubr.f32.mxu0 %v4349_v15 }
 0x336   :  { %v2449_v46 = vpop.permute.xlu0 %2448  ;;  %2083 = vmatprep.subr.mxu1 %v1976_v49  ;;  %v2131_v54 = vpop.permute.xlu1 %2130 }
 0x337   :  { %v2138_v55 = vsel %vm568_vm4, %v2129_v28, %v2131_v54  ;;  %2084 = vmatpush1.msra.mxu1 %v1975_v43  ;;  %v4354_v43 = vld [vmem:[#allocation6_spill] sm:$0xff] }
 0x338   :  { %v2141_v56 = vmul.f32 %v3773_v60, %v2138_v55  ;;  %3439 = vmatmul.mubr.msk.f32.vlgmr.msra.gmra.mxu1 %vm96_vm2, %v3437_v33  ;;  %v4353_v33 = vld [vmem:[#allocation5_spill] sm:$0xff] }
 0x339   :  { %2284 = vmatprep.mubr.f32.mxu1 %v4349_v15 }
 0x33a   :  { %v2447_v57 = vpop.permute.xlu0 %2446  ;;  %2179 = vmatprep.subr.mxu0 %v2141_v56  ;;  %v2133_v58 = vpop.permute.xlu1 %2132 }
 0x33b   :  { %v2136_v5 = vsel %vm568_vm4, %v2133_v58, %v2135_v16  ;;  %v2137_v61 = vsel %vm568_vm4, %v2131_v54, %v2133_v58  ;;  %2180 = vmatpush1.msra.mxu0 %v2140_v48  ;;  %v2456_v62 = vsel %vm892_vm5, %v2447_v57, %v2449_v46  ;;  %v3455_v54 = vld [vmem:[%s4324_s2 + $0x40] sm:$0xff]  ;;  %v4357_v58 = vld [vmem:[#allocation9_spill] sm:$0xff] }
 0x33c   :  { %v2142_v60 = vmul.f32 %v3784_v6, %v2137_v61  ;;  %v2143_v7 = vmul.f32 %v3794_v9, %v2136_v5  ;;  %2330 = vmatprep.subr.mxu0 %v3998_v40  ;;  %3441 = vmatmul.mubr.msk.f32.vlgmr.msra.gmra.mxu0 %vm96_vm2, %v3440_v50  ;;  %v3443_v6 = vld [vmem:[%s4324_s2 + $0x20] sm:$0xff]  ;;  %v3478_v61 = vld [vmem:[%s4317_s0 + $0x8] sm:$0xff] }
 0x33d   :  { %2331 = vmatpush1.msra.mxu0 %v3990_v45  ;;  %2364 = vmatprep.mubr.f32.mxu0 %v4349_v15  ;;  %v2458_v45 = vmul.f32 %v3834_v34, %v2456_v62  ;;  %v3481_v62 = vld [vmem:[%s4317_s0 + $0x10] sm:$0xff] }
 0x33e   :  { %v2616_v10 = vpop.permute.xlu0 %2615  ;;  %2250 = vmatprep.subr.mxu1 %v2143_v7  ;;  %v2451_v59 = vpop.permute.xlu1 %2450  ;;  %v3480_v7 = vld [vmem:[%s4317_s0 + $0x18] sm:$0xff] }
 0x33f   :  { %v2455_v9 = vsel %vm892_vm5, %v2449_v46, %v2451_v59  ;;  %2251 = vmatpush1.msra.mxu1 %v2142_v60  ;;  %v3479_v60 = vld [vmem:[%s4317_s0] sm:$0xff] }
 0x340   :  { %v2459_v40 = vmul.f32 %v3813_v24, %v2455_v9  ;;  %2401 = vmatprep.subr.mxu1 %v3992_v1  ;;  %3442 = vmatmul.mubr.msk.f32.vlgmr.msra.gmra.mxu1 %vm96_vm2, %v3440_v50  ;;  %v4356_v50 = vld [vmem:[#allocation7_spill] sm:$0xff] }
 0x341   :  { %3444 = vmatmul.mubr.msk.f32.vlgmr.msra.gmra.mxu0 %vm96_vm2, %v3443_v6  ;;  %2402 = vmatpush1.msra.mxu1 %v4008_v17 }
 0x342   :  { %v2614_v12 = vpop.permute.xlu0 %2613  ;;  %2497 = vmatprep.subr.mxu0 %v2459_v40  ;;  %v2453_v13 = vpop.permute.xlu1 %2452  ;;  %2435 = vmatprep.mubr.f32.mxu1 %v4349_v15 }
 0x343   :  { %v2454_v24 = vsel %vm892_vm5, %v2451_v59, %v2453_v13  ;;  %v2457_v1 = vsel %vm892_vm5, %v2453_v13, %v2447_v57  ;;  %2498 = vmatpush1.msra.mxu0 %v2458_v45  ;;  %2531 = vmatprep.mubr.f32.mxu0 %v4349_v15  ;;  %v2623_v22 = vsel %vm1065_vm6, %v2614_v12, %v2616_v10 }
 0x344   :  { %v2460_v34 = vmul.f32 %v3828_v30, %v2454_v24  ;;  %v2461_v17 = vmul.f32 %v3839_v2, %v2457_v1  ;;  %3445 = vmatmul.mubr.msk.f32.vlgmr.msra.gmra.mxu1 %vm96_vm2, %v3443_v6  ;;  %v2625_v2 = vmul.f32 %v3880_v51, %v2623_v22 }
 0x345   :  { %3447 = vmatmul.mubr.msk.f32.vlgmr.msra.gmra.mxu0 %vm96_vm2, %v3446_v19  ;;  %2602 = vmatprep.mubr.f32.mxu1 %v4349_v15 }
 0x346   :  { %v2783_v25 = vpop.permute.xlu0 %2782  ;;  %2568 = vmatprep.subr.mxu1 %v2461_v17  ;;  %v2618_v11 = vpop.permute.xlu1 %2617  ;;  %2698 = vmatprep.mubr.f32.mxu0 %v4349_v15 }
 0x347   :  { %v2622_v23 = vsel %vm1065_vm6, %v2616_v10, %v2618_v11  ;;  %2569 = vmatpush1.msra.mxu1 %v2460_v34 }
 0x348   :  { %v2626_v30 = vmul.f32 %v3863_v4, %v2622_v23  ;;  %3448 = vmatmul.mubr.msk.f32.vlgmr.msra.gmra.mxu1 %vm96_vm2, %v3446_v19 }
 0x349   :  { %2769 = vmatprep.mubr.f32.mxu1 %v4349_v15 }
 0x34a   :  { %v2781_v38 = vpop.permute.xlu0 %2780  ;;  %2664 = vmatprep.subr.mxu0 %v2626_v30  ;;  %v2620_v27 = vpop.permute.xlu1 %2619 }
 0x34b   :  { %v2621_v42 = vsel %vm1065_vm6, %v2618_v11, %v2620_v27  ;;  %v2624_v18 = vsel %vm1065_vm6, %v2620_v27, %v2614_v12  ;;  %2665 = vmatpush1.msra.mxu0 %v2625_v2  ;;  %v2790_v32 = vsel %vm1238_vm7, %v2781_v38, %v2783_v25 }
 0x34c   :  { %v2627_v4 = vmul.f32 %v3875_v47, %v2621_v42  ;;  %v2628_v51 = vmul.f32 %v3885_v52, %v2624_v18  ;;  %3450 = vmatmul.mubr.msk.f32.vlgmr.msra.gmra.mxu0 %vm96_vm2, %v3449_v26  ;;  %v4351_v47 = vld [vmem:[#allocation4_spill] sm:$0xff] }
 0x34d   :  { %2865 = vmatprep.mubr.f32.mxu0 %v4349_v15  ;;  %v2792_v52 = vmul.f32 %v4351_v47, %v2790_v32 }
 0x34e   :  { %v2950_v44 = vpop.permute.xlu0 %2949  ;;  %2735 = vmatprep.subr.mxu1 %v2628_v51  ;;  %v2785_v29 = vpop.permute.xlu1 %2784 }
 0x34f   :  { %v2789_v3 = vsel %vm1238_vm7, %v2783_v25, %v2785_v29  ;;  %2736 = vmatpush1.msra.mxu1 %v2627_v4 }
 0x350   :  { %v2793_v41 = vmul.f32 %v4350_v0, %v2789_v3  ;;  %3451 = vmatmul.mubr.msk.f32.vlgmr.msra.gmra.mxu1 %vm96_vm2, %v3449_v26 }
 0x351   :  { %2936 = vmatprep.mubr.f32.mxu1 %v4349_v15 }
 0x352   :  { %2831 = vmatprep.subr.mxu0 %v2793_v41  ;;  %v2787_v20 = vpop.permute.xlu1 %2786  ;;  %v2948_v28 = vpop.permute.xlu0 %2947 }
 0x353   :  { %v2788_v35 = vsel %vm1238_vm7, %v2785_v29, %v2787_v20  ;;  %v2791_v14 = vsel %vm1238_vm7, %v2787_v20, %v2781_v38  ;;  %2832 = vmatpush1.msra.mxu0 %v2792_v52  ;;  %v2957_v63 = vsel %vm1411_vm8, %v2948_v28, %v2950_v44 }
 0x354   :  { %v2794_v31 = vmul.f32 %v4352_v36, %v2788_v35  ;;  %v2795_v16 = vmul.f32 %v4353_v33, %v2791_v14  ;;  %3453 = vmatmul.mubr.msk.f32.vlgmr.msra.gmra.mxu0 %vm96_vm2, %v3452_v21  ;;  %v2959_v46 = vmul.f32 %v4355_v39, %v2957_v63 }
 0x355   :  { %3032 = vmatprep.mubr.f32.mxu0 %v4349_v15 }
 0x356   :  { %2902 = vmatprep.subr.mxu1 %v2795_v16  ;;  %v2952_v37 = vpop.permute.xlu1 %2951 }
 0x357   :  { %v2956_v53 = vsel %vm1411_vm8, %v2950_v44, %v2952_v37  ;;  %2903 = vmatpush1.msra.mxu1 %v2794_v31 }
 0x358   :  { %v2960_v49 = vmul.f32 %v4354_v43, %v2956_v53  ;;  %3454 = vmatmul.mubr.msk.f32.vlgmr.msra.gmra.mxu1 %vm96_vm2, %v3452_v21 }
 0x359   :  { %3103 = vmatprep.mubr.f32.mxu1 %v4349_v15 }
 0x35a   :  { %2998 = vmatprep.subr.mxu0 %v2960_v49  ;;  %v2954_v55 = vpop.permute.xlu1 %2953 }
 0x35b   :  { %v2955_v56 = vsel %vm1411_vm8, %v2952_v37, %v2954_v55  ;;  %v2958_v48 = vsel %vm1411_vm8, %v2954_v55, %v2948_v28  ;;  %2999 = vmatpush1.msra.mxu0 %v2959_v46 }
 0x35c   :  { %v2961_v57 = vmul.f32 %v4356_v50, %v2955_v56  ;;  %v2962_v5 = vmul.f32 %v4357_v58, %v2958_v48  ;;  %3456 = vmatmul.mubr.msk.f32.vlgmr.msra.gmra.mxu0 %vm96_vm2, %v3455_v54  ;;  %3204 = vmatprep.subr.mxu0 %v3478_v61 }
 0x35d   :  { %3205 = vmatpush1.msra.mxu0 %v3479_v60  ;;  %3238 = vmatprep.mubr.f32.mxu0 %v4349_v15 }
 0x35e   :  { %3069 = vmatprep.subr.mxu1 %v2962_v5 }
 0x35f   :  { %3070 = vmatpush1.msra.mxu1 %v2961_v57  ;;  %v3118_v60 = vpop.permute.xlu0 %3117 }
 0x360   :  { %3457 = vmatmul.mubr.msk.f32.vlgmr.msra.gmra.mxu1 %vm96_vm2, %v3455_v54  ;;  %3458 = vmatmul.mubr.msk.f32.vlgmr.msra.gmra.mxu0 %vm96_vm2, %v3170_v8 }
 0x361   :  { %3275 = vmatprep.subr.mxu1 %v3480_v7  ;;  %3309 = vmatprep.mubr.f32.mxu1 %v4349_v15 }
 0x362   :  { %3276 = vmatpush1.msra.mxu1 %v3481_v62 }
 0x364   :  { %3459 = vmatmul.mubr.msk.f32.vlgmr.msra.gmra.mxu1 %vm96_vm2, %v3170_v8 }
 0x3e4   :  { %v1740_v10 = vpop.f32.mrf.mxu0 }
 0x3e6   :  { %v1742_v59 = vpop.f32.mrf.mxu0 }
 0x3e8   :  { %v1885_v9 = vpop.f32.mrf.mxu0 }
 0x3e9   :  { %v1886_v2 = vadd.f32 %v1885_v9, %v1740_v10 }
 0x3ea   :  { %v1887_v45 = vpop.f32.mrf.mxu0 }
 0x3eb   :  { %v1888_v27 = vadd.f32 %v1887_v45, %v1742_v59 }
 0x3ec   :  { %v1811_v6 = vpop.f32.mrf.mxu1 }
 0x3ee   :  { %v1813_v40 = vpop.f32.mrf.mxu1 }
 0x3f0   :  { %v1956_v12 = vpop.f32.mrf.mxu1 }
 0x3f1   :  { %v1957_v42 = vadd.f32 %v1956_v12, %v1811_v6 }
 0x3f2   :  { %v1958_v19 = vpop.f32.mrf.mxu1 }
 0x3f3   :  { %v1959_v32 = vadd.f32 %v1958_v19, %v1813_v40 }
 0x3f4   :  { %v2048_v13 = vpop.f32.mrf.mxu0 }
 0x3f5   :  { %v2124_v18 = vadd.f32 %v2048_v13, %v1886_v2 }
 0x3f6   :  { %v2050_v24 = vpop.f32.mrf.mxu0 }
 0x3f7   :  { %v2125_v44 = vadd.f32 %v2050_v24, %v1888_v27 }
 0x3f8   :  { %v2119_v1 = vpop.f32.mrf.mxu1 }
 0x3f9   :  { %v2126_v29 = vadd.f32 %v2119_v1, %v1957_v42 }
 0x3fa   :  { %v2121_v15 = vpop.f32.mrf.mxu1 }
 0x3fb   :  { %v2127_v47 = vadd.f32 %v2121_v15, %v1959_v32 }
 0x3fc   :  { %v2215_v34 = vpop.f32.mrf.mxu0 }
 0x3fd   :  { %v2291_v3 = vadd.f32 %v2215_v34, %v2124_v18 }
 0x3fe   :  { %v2217_v17 = vpop.f32.mrf.mxu0 }
 0x3ff   :  { %v2292_v52 = vadd.f32 %v2217_v17, %v2125_v44 }
 0x400   :  { %v2286_v22 = vpop.f32.mrf.mxu1 }
 0x401   :  { %v2366_v25 = vpop.f32.mrf.mxu0  ;;  %v2293_v21 = vadd.f32 %v2286_v22, %v2126_v29 }
 0x402   :  { %v2288_v11 = vpop.f32.mrf.mxu1  ;;  %v2442_v20 = vadd.f32 %v2366_v25, %v2291_v3 }
 0x403   :  { %v2368_v23 = vpop.f32.mrf.mxu0  ;;  %v2294_v36 = vadd.f32 %v2288_v11, %v2127_v47 }
 0x404   :  { %v2437_v30 = vpop.f32.mrf.mxu1  ;;  %v2443_v31 = vadd.f32 %v2368_v23, %v2292_v52 }
 0x405   :  { %v2533_v26 = vpop.f32.mrf.mxu0  ;;  %v2444_v33 = vadd.f32 %v2437_v30, %v2293_v21 }
 0x406   :  { %v2439_v38 = vpop.f32.mrf.mxu1  ;;  %v2609_v16 = vadd.f32 %v2533_v26, %v2442_v20 }
 0x407   :  { %v2535_v4 = vpop.f32.mrf.mxu0  ;;  %v2445_v39 = vadd.f32 %v2439_v38, %v2294_v36 }
 0x408   :  { %v2604_v51 = vpop.f32.mrf.mxu1  ;;  %v2610_v37 = vadd.f32 %v2535_v4, %v2443_v31 }
 0x409   :  { %v2611_v46 = vadd.f32 %v2604_v51, %v2444_v33 }
 0x40a   :  { %v2606_v41 = vpop.f32.mrf.mxu1 }
 0x40b   :  { %v2612_v48 = vadd.f32 %v2606_v41, %v2445_v39  ;;  %v3124_v39 = vld [vmem:[%s4326_s8] sm:$0xff] }
 0x40c   :  { %v2700_v0 = vpop.f32.mrf.mxu0 }
 0x40d   :  { %v2776_v53 = vadd.f32 %v2700_v0, %v2609_v16 }
 0x40e   :  { %v2702_v28 = vpop.f32.mrf.mxu0 }
 0x40f   :  { %v2777_v54 = vadd.f32 %v2702_v28, %v2610_v37 }
 0x410   :  { %v2771_v35 = vpop.f32.mrf.mxu1 }
 0x411   :  { %v2778_v50 = vadd.f32 %v2771_v35, %v2611_v46  ;;  %v3316_v46 = vld [vmem:[%s4327_s10] sm:$0xff] }
 0x412   :  { %v2773_v63 = vpop.f32.mrf.mxu1 }
 0x413   :  { %v2779_v8 = vadd.f32 %v2773_v63, %v2612_v48 }
 0x414   :  { %v2867_v14 = vpop.f32.mrf.mxu0 }
 0x415   :  { %v2943_v55 = vadd.f32 %v2867_v14, %v2776_v53 }
 0x416   :  { %v2869_v43 = vpop.f32.mrf.mxu0 }
 0x417   :  { %v2944_v57 = vadd.f32 %v2869_v43, %v2777_v54 }
 0x418   :  { %v2938_v49 = vpop.f32.mrf.mxu1 }
 0x419   :  { %v2945_v7 = vadd.f32 %v2938_v49, %v2778_v50  ;;  %v3317_v50 = vld [vmem:[%s4328_s11] sm:$0xff] }
 0x41a   :  { %v2940_v5 = vpop.f32.mrf.mxu1 }
 0x41b   :  { %v2946_v9 = vadd.f32 %v2940_v5, %v2779_v8 }
 0x41c   :  { %v3034_v56 = vpop.f32.mrf.mxu0 }
 0x41d   :  { %v3110_v58 = vadd.f32 %v3034_v56, %v2943_v55 }
 0x41e   :  { %v3036_v61 = vpop.f32.mrf.mxu0 }
 0x41f   :  { %v3111_v62 = vadd.f32 %v3036_v61, %v2944_v57  ;;  %v4245_v10 = vadd.f32 %v3118_v60, %v3110_v58  ;;  %v3125_v57 = vld [vmem:[%s4329_s9] sm:$0xff] }
 0x420   :  { %v3105_v59 = vpop.f32.mrf.mxu1  ;;  %v4247_v6 = vpop.f32.mrf.mxu0 }
 0x421   :  { %v4249_v40 = vadd.f32 %v3118_v60, %v3111_v62  ;;  %v3112_v45 = vadd.f32 %v3105_v59, %v2945_v7  ;;  %v3131_v15 = vmul.f32 %v4245_v10, %v4245_v10  ;;  %v3323_v17 = vmul.f32 %v4247_v6, %v4247_v6 }
 0x422   :  { %v3107_v12 = vpop.f32.mrf.mxu1  ;;  %v4251_v13 = vpop.f32.mrf.mxu0 }
 0x423   :  { %v3132_v19 = vmul.f32 %v4249_v40, %v4249_v40  ;;  %v4255_v24 = vadd.f32 %v3118_v60, %v3112_v45  ;;  %v3113_v1 = vadd.f32 %v3107_v12, %v2946_v9  ;;  %v3318_v34 = vadd.f32 %v4251_v13, %v4247_v6 }
 0x424   :  { %v3324_v22 = vmul.f32 %v4251_v13, %v4251_v13  ;;  %v4265_v25 = vpop.f32.mrf.mxu1  ;;  %v3126_v11 = vadd.f32 %v4249_v40, %v4245_v10 }
 0x425   :  { %v4269_v23 = vadd.f32 %v3118_v60, %v3113_v1  ;;  %v3325_v30 = vmul.f32 %v4265_v25, %v4265_v25  ;;  %v3319_v2 = vadd.f32 %v3318_v34, %v4265_v25  ;;  %v3133_v26 = vmul.f32 %v4255_v24, %v4255_v24 }
 0x426   :  { %v3327_v38 = vadd.f32 %v3324_v22, %v3323_v17  ;;  %v4276_v27 = vpop.f32.mrf.mxu1  ;;  %v3127_v42 = vadd.f32 %v3126_v11, %v4255_v24  ;;  %v3135_v18 = vadd.f32 %v3132_v19, %v3131_v15 }
 0x427   :  { %v3320_v4 = vadd.f32 %v3319_v2, %v4276_v27  ;;  %v3134_v51 = vmul.f32 %v4269_v23, %v4269_v23  ;;  %v3326_v32 = vmul.f32 %v4276_v27, %v4276_v27 }
 0x428   :  { %v3128_v44 = vadd.f32 %v3127_v42, %v4269_v23  ;;  %v3136_v29 = vadd.f32 %v3135_v18, %v3133_v26  ;;  %v3328_v3 = vadd.f32 %v3327_v38, %v3325_v30 }
 0x429   :  { %3321 = vadd.xlane.f32.xlu0 %v3320_v4 }
 0x42a   :  { %3129 = vadd.xlane.f32.xlu1 %v3128_v44  ;;  %v3137_v0 = vadd.f32 %v3136_v29, %v3134_v51  ;;  %v3329_v41 = vadd.f32 %v3328_v3, %v3326_v32 }
 0x42d   :  { %3138 = vadd.xlane.f32.xlu0 %v3137_v0 }
 0x42e   :  { %3330 = vadd.xlane.f32.xlu1 %v3329_v41 }
 0x4b2   :  { %v3322_v47 = vpop.xlane.xlu0 %3321 }
 0x4b3   :  { %v3130_v52 = vpop.xlane.xlu1 %3129  ;;  %v3332_v21 = vmul.f32 0.001953125, %v3322_v47 }
 0x4b4   :  { %v3140_v20 = vmul.f32 0.001953125, %v3130_v52 }
 0x4b5   :  { %v3334_v31 = vmul.f32 %v3332_v21, %v3332_v21  ;;  %v3337_v61 = vsub.f32 %v4247_v6, %v3332_v21  ;;  %v3338_v60 = vsub.f32 %v4251_v13, %v3332_v21  ;;  %v3339_v8 = vsub.f32 %v4265_v25, %v3332_v21 }
 0x4b6   :  { %v3139_v28 = vpop.xlane.xlu0 %3138  ;;  %v3142_v14 = vmul.f32 %v3140_v20, %v3140_v20  ;;  %v3340_v7 = vsub.f32 %v4276_v27, %v3332_v21  ;;  %v3145_v62 = vsub.f32 %v4245_v10, %v3140_v20  ;;  %v3146_v59 = vsub.f32 %v4249_v40, %v3140_v20 }
 0x4b7   :  { %v3141_v35 = vmul.f32 0.001953125, %v3139_v28  ;;  %v3331_v36 = vpop.xlane.xlu1 %3330  ;;  %v3147_v9 = vsub.f32 %v4255_v24, %v3140_v20  ;;  %v3148_v45 = vsub.f32 %v4269_v23, %v3140_v20 }
 0x4b8   :  { %v3333_v33 = vmul.f32 0.001953125, %v3331_v36 }
 0x4b9   :  { %v3143_v16 = vsub.f32 %v3141_v35, %v3142_v14 }
 0x4ba   :  { %v3335_v63 = vsub.f32 %v3333_v33, %v3334_v31 }
 0x4bb   :  { %v3144_v37 = vmax.f32 %v3143_v16, 0.0 }
 0x4bc   :  { %v3336_v53 = vmax.f32 %v3335_v63, 0.0 }
 0x4bd   :  { %v3149_v43 = vadd.f32 1e-05, %v3144_v37 }
 0x4be   :  { %v3341_v49 = vadd.f32 1e-05, %v3336_v53 }
 0x4bf   :  { %3474 = vrsqrt.f32 %v3149_v43 }
 0x4c0   :  { %3476 = vrsqrt.f32 %v3341_v49 }
 0x4cc   :  { %v3475_v54 = vpop.eup %3474 }
 0x4cd   :  { %v3477_v55 = vpop.eup %3476  ;;  %v3151_v56 = vmul.f32 %v3475_v54, %v3124_v39 }
 0x4ce   :  { %v3343_v48 = vmul.f32 %v3477_v55, %v3316_v46 }
 0x4cf   :  { %3154 = vperm.xlu0 %3470, %v3151_v56  }
 0x4d0   :  { %3346 = vperm.xlu1 %3471, %v3343_v48  }
 0x4d3   :  { %3355 = vperm.xlu0 %3470, %v3317_v50  }
 0x4d4   :  { %3163 = vperm.xlu1 %3471, %v3125_v57  }
 0x54a   :  { %v3155_v58 = vpop.permute.xlu0 %3154 }
 0x54b   :  { %v3347_v5 = vpop.permute.xlu1 %3346  ;;  %v3157_v6 = vmul.f32 %v3155_v58, %v3145_v62  ;;  %v3158_v17 = vmul.f32 %v3155_v58, %v3146_v59  ;;  %v3159_v13 = vmul.f32 %v3155_v58, %v3147_v9  ;;  %v3160_v22 = vmul.f32 %v3155_v58, %v3148_v45 }
 0x54c   :  { %v3349_v12 = vmul.f32 %v3347_v5, %v3337_v61  ;;  %v3350_v19 = vmul.f32 %v3347_v5, %v3338_v60  ;;  %v3351_v1 = vmul.f32 %v3347_v5, %v3339_v8  ;;  %v3352_v34 = vmul.f32 %v3347_v5, %v3340_v7 }
 0x54e   :  { %v3356_v15 = vpop.permute.xlu0 %3355 }
 0x54f   :  { %v3358_v25 = vadd.f32 %v3356_v15, %v3349_v12  ;;  %v3359_v11 = vadd.f32 %v3356_v15, %v3350_v19  ;;  %v3360_v30 = vadd.f32 %v3356_v15, %v3351_v1  ;;  %v3361_v2 = vadd.f32 %v3356_v15, %v3352_v34  ;;  %v3164_v10 = vpop.permute.xlu1 %3163 }
 0x550   :  { %v3166_v26 = vadd.f32 %v3164_v10, %v3157_v6  ;;  %v3167_v40 = vadd.f32 %v3164_v10, %v3158_v17  ;;  %v3168_v38 = vadd.f32 %v3164_v10, %v3159_v13  ;;  %v3169_v24 = vadd.f32 %v3164_v10, %v3160_v22 }
 0x552   :  { %v3362_v27 = vadd.f32 %v3358_v25, %v3166_v26  ;;  %v3363_v23 = vadd.f32 %v3359_v11, %v3167_v40  ;;  %v3364_v42 = vadd.f32 %v3360_v30, %v3168_v38  ;;  %v3365_v18 = vadd.f32 %v3361_v2, %v3169_v24 }
 0x554   :  { %v3366_v4 = vmax.f32 %v3362_v27, 0.0  ;;  %v3367_v51 = vmax.f32 %v3363_v23, 0.0  ;;  %v3368_v32 = vmax.f32 %v3364_v42, 0.0  ;;  %v3369_v44 = vmax.f32 %v3365_v18, 0.0 }
 0x556   :  { %3370 = vst [vmem:[%s4330_s13] sm:$0xff] %v3366_v4  ;;  %3371 = vst [vmem:[%s4330_s13 + $0x8] sm:$0xff] %v3367_v51 }
 0x557   :  { %3372 = vst [vmem:[%s4330_s13 + $0x10] sm:$0xff] %v3368_v32  ;;  %3373 = vst [vmem:[%s4330_s13 + $0x18] sm:$0xff] %v3369_v44 }

</bundles_post_ra>
